<compile_context>
chip_gen: v7x
topology: tpu7x:2x2x1
jax: 0.10.0
libtpu: 0.0.40
codegen_flags: <defaults>
</compile_context>

<pallas_src>
import functools
import math

import jax
import jax.numpy as jnp
from jax.experimental import pallas as pl
from jax.experimental.pallas import tpu as pltpu

_LN_EPS = 1e-5
_NEG_INF = -1e30

# Row layout of the packed (NVEC, d_model) small-vector operand.
_NVEC = 10
(_BO_S, _G1, _BE1,                 # self-attn out bias, layernorm1 gamma/beta
 _BQ_C, _BO_C, _G2, _BE2,          # cross-attn q bias, out bias, layernorm2 g/b
 _B2F, _G3, _BE3) = range(_NVEC)   # ffn lin2 bias, layernorm3 gamma/beta


# ----------------------------------------------------------------------------
# In-kernel helpers
# ----------------------------------------------------------------------------
def _add_layernorm(x, y, g, b):
    """Residual add + layernorm, all in f32."""
    s = x + y
    mean = jnp.mean(s, axis=-1, keepdims=True)
    var = jnp.mean(jnp.square(s - mean), axis=-1, keepdims=True)
    return (s - mean) * jax.lax.rsqrt(var + _LN_EPS) * g + b


def _attend(q, k, v, ctx_ref, nhead, mask):
    """Multi-head softmax attention (softmax scale pre-folded into Q).

    Each head's p @ v is stored straight into the persistent (tq, D) f32
    VMEM scratch at a static lane offset -- no lane-axis concatenate.
    """
    d = q.shape[-1]
    dh = d // nhead
    for h in range(nhead):
        lo = h * dh
        q_h = q[:, lo:lo + dh].astype(jnp.bfloat16)
        k_h = k[:, lo:lo + dh].astype(jnp.bfloat16)
        v_h = v[:, lo:lo + dh].astype(jnp.bfloat16)
        s = jax.lax.dot_general(q_h, k_h, (((1,), (1,)), ((), ())),
                                preferred_element_type=jnp.float32)
        if mask is not None:
            s = jnp.where(mask, s, _NEG_INF)
        m = jnp.max(s, axis=-1, keepdims=True)
        e = jnp.exp(s - m)
        inv = pl.reciprocal(jnp.sum(e, axis=-1, keepdims=True), approx=True)
        p = (e * inv).astype(jnp.bfloat16)
        ctx_ref[:, lo:lo + dh] = jnp.dot(p, v_h,
                                         preferred_element_type=jnp.float32)
    return ctx_ref[...]


# ----------------------------------------------------------------------------
# Fused decoder-layer kernel (self-attn + cross-attn + FFN + 3x add&norm)
# ----------------------------------------------------------------------------
def _decoder_layer_kernel(x_ref, mem_ref,
                          wqkv_s_ref, bqkv_s_ref, wo_s_ref,
                          wq_c_ref, wkv_c_ref, bkv_c_ref, wo_c_ref,
                          w1_ref, b1_ref, w2_ref, vecs_ref,
                          o_ref, ctx_ref,
                          *, nhead, tq, n_q_tiles, causal):
    d = x_ref.shape[-1]
    l_tgt = x_ref.shape[1]

    x_full = x_ref[0]                           # (L, D) bf16 : self-attn K/V src
    if n_q_tiles == 1:
        q_start = 0
        x_q = x_full                            # query tile == full sequence
    else:
        q_start = pl.multiple_of(pl.program_id(1) * tq, 8)
        x_q = x_ref[0, pl.ds(q_start, tq), :]   # (tq, D) bf16
    x_res = x_q.astype(jnp.float32)             # f32 residual stream

    # Causal mask generated in-kernel -> zero HBM mask traffic.
    if causal:
        q_pos = q_start + jax.lax.broadcasted_iota(jnp.int32, (tq, l_tgt), 0)
        k_pos = jax.lax.broadcasted_iota(jnp.int32, (tq, l_tgt), 1)
        self_mask = k_pos <= q_pos
    else:
        self_mask = None

    # ------------------- self-attention sub-block -------------------
    # 1/sqrt(head_dim) already folded into the Q third of wqkv/bqkv.
    if n_q_tiles == 1:
        qkv = jnp.dot(x_full, wqkv_s_ref[...],
                      preferred_element_type=jnp.float32) + bqkv_s_ref[...]
        q_s, k_s, v_s = qkv[:, :d], qkv[:, d:2 * d], qkv[:, 2 * d:]
    else:
        q_s = jnp.dot(x_q, wqkv_s_ref[:, :d],
                      preferred_element_type=jnp.float32) + bqkv_s_ref[:, :d]
        kv = jnp.dot(x_full, wqkv_s_ref[:, d:],
                     preferred_element_type=jnp.float32) + bqkv_s_ref[:, d:]
        k_s, v_s = kv[:, :d], kv[:, d:]

    ctx = _attend(q_s, k_s, v_s, ctx_ref, nhead, self_mask)
    proj = jnp.dot(ctx.astype(jnp.bfloat16), wo_s_ref[...],
                   preferred_element_type=jnp.float32) \
        + vecs_ref[_BO_S:_BO_S + 1, :]
    h1 = _add_layernorm(x_res, proj,
                        vecs_ref[_G1:_G1 + 1, :], vecs_ref[_BE1:_BE1 + 1, :])

    # ------------------- cross-attention sub-block ------------------
    q_c = jnp.dot(h1.astype(jnp.bfloat16), wq_c_ref[...],
                  preferred_element_type=jnp.float32) \
        + vecs_ref[_BQ_C:_BQ_C + 1, :]
    kv_c = jnp.dot(mem_ref[0], wkv_c_ref[...],
                   preferred_element_type=jnp.float32) + bkv_c_ref[...]
    ctx = _attend(q_c, kv_c[:, :d], kv_c[:, d:], ctx_ref, nhead, None)
    proj = jnp.dot(ctx.astype(jnp.bfloat16), wo_c_ref[...],
                   preferred_element_type=jnp.float32) \
        + vecs_ref[_BO_C:_BO_C + 1, :]
    h2 = _add_layernorm(h1, proj,
                        vecs_ref[_G2:_G2 + 1, :], vecs_ref[_BE2:_BE2 + 1, :])

    # ------------------- feed-forward sub-block ---------------------
    hid = jnp.dot(h2.astype(jnp.bfloat16), w1_ref[...],
                  preferred_element_type=jnp.float32) + b1_ref[...]
    hid = jnp.maximum(hid, 0.0)
    f = jnp.dot(hid.astype(jnp.bfloat16), w2_ref[...],
                preferred_element_type=jnp.float32) \
        + vecs_ref[_B2F:_B2F + 1, :]
    h3 = _add_layernorm(h2, f,
                        vecs_ref[_G3:_G3 + 1, :], vecs_ref[_BE3:_BE3 + 1, :])

    o_ref[0] = h3.astype(o_ref.dtype)


# ----------------------------------------------------------------------------
# pallas_call wrapper (one call per decoder layer)
# ----------------------------------------------------------------------------
def _pick_tq(length):
    """Query-tile size: full length if small, else the largest multiple-of-8
    divisor <= 256 (keeps blocks (8,128)-friendly and bounds VMEM)."""
    if length <= 256:
        return length
    for cand in (256, 128, 64, 32, 16, 8):
        if length % cand == 0:
            return cand
    return length


@functools.lru_cache(maxsize=None)
def _compiler_params():
    try:
        cap = int(getattr(pltpu.get_tpu_info(), "vmem_capacity_bytes",
                          64 * 1024 * 1024))
    except Exception:
        cap = 64 * 1024 * 1024
    # Per-generation limit: ~75% of physical VMEM, capped at 100 MiB
    # (v5e/v6e -> ~96-100 MiB, v7x -> 48 MiB).
    limit = max(min(cap * 3 // 4, 100 * 1024 * 1024), 32 * 1024 * 1024)
    return pltpu.CompilerParams(
        dimension_semantics=("parallel", "parallel"),
        vmem_limit_bytes=int(limit),
    )


def _layer_cost(bsz, l_tgt, l_mem, d, dff, n_qt):
    proj = (2 * l_tgt * d * 3 * d            # fused self QKV
            + 2 * l_tgt * d * d              # self out proj
            + 2 * l_tgt * d * d              # cross Q proj
            + n_qt * 2 * l_mem * d * 2 * d   # cross KV proj (per query tile)
            + 2 * l_tgt * d * d              # cross out proj
            + 4 * l_tgt * d * dff)           # FFN
    attn = 4 * l_tgt * l_tgt * d + 4 * l_tgt * l_mem * d
    flops = bsz * (proj + attn)
    transcendentals = bsz * (l_tgt * l_tgt + l_tgt * l_mem)
    weight_bytes = 2 * (3 * d * d + 3 * d * d + 2 * d * d + 2 * d * dff)
    act_bytes = 2 * bsz * (2 * l_tgt * d + l_mem * d)
    return int(flops), int(transcendentals), int(act_bytes + bsz * n_qt * weight_bytes)


def decoder_layer_call(x, memory, lp, *, nhead, causal):
    bsz, l_tgt, d = x.shape
    l_mem = memory.shape[1]
    dff = lp["w1"].shape[1]
    tq = _pick_tq(l_tgt)
    n_qt = l_tgt // tq
    kern = functools.partial(_decoder_layer_kernel, nhead=nhead, tq=tq,
                             n_q_tiles=n_qt, causal=causal)

    def rep(shape):  # operand replicated across the whole grid
        return pl.BlockSpec(shape, lambda b, t: (0,) * len(shape))

    flops, trans, nbytes = _layer_cost(bsz, l_tgt, l_mem, d, dff, n_qt)
    return pl.pallas_call(
        kern,
        out_shape=jax.ShapeDtypeStruct((bsz, l_tgt, d), jnp.bfloat16),
        grid=(bsz, n_qt),
        in_specs=[
            pl.BlockSpec((1, l_tgt, d), lambda b, t: (b, 0, 0)),   # tgt (full seq)
            pl.BlockSpec((1, l_mem, d), lambda b, t: (b, 0, 0)),   # memory
            rep((d, 3 * d)), rep((1, 3 * d)), rep((d, d)),         # self-attn
            rep((d, d)), rep((d, 2 * d)), rep((1, 2 * d)), rep((d, d)),  # cross
            rep((d, dff)), rep((1, dff)), rep((dff, d)),           # FFN
            rep((_NVEC, d)),                                       # packed vecs
        ],
        out_specs=pl.BlockSpec((1, tq, d), lambda b, t: (b, t, 0)),
        scratch_shapes=[pltpu.VMEM((tq, d), jnp.float32)],
        compiler_params=_compiler_params(),
        cost_estimate=pl.CostEstimate(flops=flops, transcendentals=trans,
                                      bytes_accessed=nbytes),
    )(x, memory, lp["wqkv_s"], lp["bqkv_s"], lp["wo_s"],
      lp["wq_c"], lp["wkv_c"], lp["bkv_c"], lp["wo_c"],
      lp["w1"], lp["b1"], lp["w2"], lp["vecs"])


def ardecoder_forward(params, tgt, memory, *, nhead, causal=True):
    """Equivalent of ARDecoder.forward(tgt, memory, tgt_mask) in eval mode.

    causal=True  <-> tgt_mask = square-subsequent (autoregressive) mask.
    causal=False <-> tgt_mask = None.
    """
    # TODO(synk): arbitrary user-supplied additive tgt_mask (padding masks)
    # would need an extra mask operand and a fully-masked-row guard.
    x = tgt.astype(jnp.bfloat16)        # self.dropout(tgt): identity in eval
    mem = memory.astype(jnp.bfloat16)
    for lp in params["layers"]:
        x = decoder_layer_call(x, mem, lp, nhead=nhead, causal=causal)
    return x.astype(jnp.float32)


# ----------------------------------------------------------------------------
# Parameter init (deterministic, synthetic)
# ----------------------------------------------------------------------------
def init_ardecoder_params(key, d_model, nhead, num_layers, dim_feedforward=None):
    d = d_model
    dff = dim_feedforward if dim_feedforward is not None else 4 * d
    dh = d // nhead
    scale = 1.0 / math.sqrt(dh)         # softmax scale folded into Q weights

    def dense(k, fan_in, fan_out):
        return 0.02 * jax.random.normal(k, (fan_in, fan_out), jnp.float32)

    layers = []
    for lk in jax.random.split(key, num_layers):
        ks = jax.random.split(lk, 9)
        wq_s, wk_s, wv_s = (dense(ks[i], d, d) for i in range(3))
        wqkv_s = jnp.concatenate([wq_s * scale, wk_s, wv_s], axis=1)
        vecs = jnp.zeros((_NVEC, d), jnp.float32)
        vecs = vecs.at[_G1].set(1.0).at[_G2].set(1.0).at[_G3].set(1.0)
        layers.append({
            "wqkv_s": wqkv_s.astype(jnp.bfloat16),
            "bqkv_s": jnp.zeros((1, 3 * d), jnp.float32),   # Q part pre-scaled
            "wo_s": dense(ks[3], d, d).astype(jnp.bfloat16),
            "wq_c": (dense(ks[4], d, d) * scale).astype(jnp.bfloat16),
            "wkv_c": dense(ks[5], d, 2 * d).astype(jnp.bfloat16),
            "bkv_c": jnp.zeros((1, 2 * d), jnp.float32),
            "wo_c": dense(ks[6], d, d).astype(jnp.bfloat16),
            "w1": dense(ks[7], d, dff).astype(jnp.bfloat16),
            "b1": jnp.zeros((1, dff), jnp.float32),
            "w2": dense(ks[8], dff, d).astype(jnp.bfloat16),
            "vecs": vecs,
        })
    return {"layers": layers, "d_model": d, "nhead": nhead}


# ----------------------------------------------------------------------------
# Main
# ----------------------------------------------------------------------------
if __name__ == "__main__":
    key = jax.random.PRNGKey(0)
    k_params, k_tgt, k_mem = jax.random.split(key, 3)

    batch, tgt_len, mem_len = 2, 8, 16
    d_model, nhead, num_layers = 32, 4, 2   # realistic configs: D % 128 == 0

    params = init_ardecoder_params(k_params, d_model, nhead, num_layers)
    tgt = jax.random.normal(k_tgt, (batch, tgt_len, d_model), jnp.float32)
    memory = jax.random.normal(k_mem, (batch, mem_len, d_model), jnp.float32)

    fwd = jax.jit(functools.partial(ardecoder_forward, nhead=nhead, causal=True))

    out = jax.block_until_ready(fwd(params, tgt, memory))
    assert out.shape == (batch, tgt_len, d_model)
    assert bool(jnp.all(jnp.isfinite(out)))

    # Causal-mask semantics: perturbing the last target position must not
    # change the decoder output at position 0.
    tgt_perturbed = tgt.at[:, -1, :].add(1.0)
    out2 = jax.block_until_ready(fwd(params, tgt_perturbed, memory))
    assert bool(jnp.allclose(out[:, 0], out2[:, 0], atol=1e-4, rtol=1e-4))

    print("KERNEL_OK")
</pallas_src>

<mosaic_0001>
module attributes {stable_mosaic.version = 11 : i64} {
  func.func @_decoder_layer_kernel(%arg0: i32, %arg1: i32, %arg2: memref<1x8x32xbf16, #tpu.memory_space<vmem>>, %arg3: memref<1x16x32xbf16, #tpu.memory_space<vmem>>, %arg4: memref<32x96xbf16, #tpu.memory_space<vmem>>, %arg5: memref<1x96xf32, #tpu.memory_space<vmem>>, %arg6: memref<32x32xbf16, #tpu.memory_space<vmem>>, %arg7: memref<32x32xbf16, #tpu.memory_space<vmem>>, %arg8: memref<32x64xbf16, #tpu.memory_space<vmem>>, %arg9: memref<1x64xf32, #tpu.memory_space<vmem>>, %arg10: memref<32x32xbf16, #tpu.memory_space<vmem>>, %arg11: memref<32x128xbf16, #tpu.memory_space<vmem>>, %arg12: memref<1x128xf32, #tpu.memory_space<vmem>>, %arg13: memref<128x32xbf16, #tpu.memory_space<vmem>>, %arg14: memref<10x32xf32, #tpu.memory_space<vmem>>, %arg15: memref<1x8x32xbf16, #tpu.memory_space<vmem>>, %arg16: memref<8x32xf32, #tpu.memory_space<vmem>>) attributes {dimension_semantics = [#tpu.dimension_semantics<parallel>, #tpu.dimension_semantics<parallel>], iteration_bounds = array<i64: 2, 1>, scalar_prefetch = 0 : i64, scratch_operands = 1 : i64, tpu.core_type = #tpu.core_type<tc>, window_params = [{transform_indices = @transform_0, window_bounds = array<i64: 1, 8, 32>}, {transform_indices = @transform_1, window_bounds = array<i64: 1, 16, 32>}, {pipeline_mode = #tpu.pipeline_mode<synchronous>, transform_indices = @transform_2, window_bounds = array<i64: 32, 96>}, {pipeline_mode = #tpu.pipeline_mode<synchronous>, transform_indices = @transform_3, window_bounds = array<i64: 1, 96>}, {pipeline_mode = #tpu.pipeline_mode<synchronous>, transform_indices = @transform_4, window_bounds = array<i64: 32, 32>}, {pipeline_mode = #tpu.pipeline_mode<synchronous>, transform_indices = @transform_5, window_bounds = array<i64: 32, 32>}, {pipeline_mode = #tpu.pipeline_mode<synchronous>, transform_indices = @transform_6, window_bounds = array<i64: 32, 64>}, {pipeline_mode = #tpu.pipeline_mode<synchronous>, transform_indices = @transform_7, window_bounds = array<i64: 1, 64>}, {pipeline_mode = #tpu.pipeline_mode<synchronous>, transform_indices = @transform_8, window_bounds = array<i64: 32, 32>}, {pipeline_mode = #tpu.pipeline_mode<synchronous>, transform_indices = @transform_9, window_bounds = array<i64: 32, 128>}, {pipeline_mode = #tpu.pipeline_mode<synchronous>, transform_indices = @transform_10, window_bounds = array<i64: 1, 128>}, {pipeline_mode = #tpu.pipeline_mode<synchronous>, transform_indices = @transform_11, window_bounds = array<i64: 128, 32>}, {pipeline_mode = #tpu.pipeline_mode<synchronous>, transform_indices = @transform_12, window_bounds = array<i64: 10, 32>}, {transform_indices = @transform_13, window_bounds = array<i64: 1, 8, 32>}]} {
    %c0 = arith.constant 0 : index
    %c0_0 = arith.constant 0 : index
    %c0_1 = arith.constant 0 : index
    %0 = vector.load %arg2[%c0, %c0_0, %c0_1] : memref<1x8x32xbf16, #tpu.memory_space<vmem>>, vector<1x8x32xbf16>
    %1 = vector.shape_cast %0 : vector<1x8x32xbf16> to vector<8x32xbf16>
    %2 = arith.extf %1 : vector<8x32xbf16> to vector<8x32xf32>
    %3 = tpu.iota {dimensions = array<i32: 0>} : vector<8x8xi32>
    %c0_i32 = arith.constant 0 : i32
    %4 = vector.broadcast %c0_i32 : i32 to vector<8x8xi32>
    %5 = arith.addi %4, %3 : vector<8x8xi32>
    %6 = tpu.iota {dimensions = array<i32: 1>} : vector<8x8xi32>
    %7 = arith.cmpi sle, %6, %5 : vector<8x8xi32>
    %c0_2 = arith.constant 0 : index
    %c0_3 = arith.constant 0 : index
    %8 = vector.load %arg4[%c0_2, %c0_3] : memref<32x96xbf16, #tpu.memory_space<vmem>>, vector<32x96xbf16>
    %cst = arith.constant dense<0.000000e+00> : vector<8x96xf32>
    %9 = tpu.matmul %1, %8, %cst {dimension_numbers = #tpu.dot_dimension_numbers<[1], [0], [0], [1], [0, 0, 1, 1], [], []>} : vector<8x32xbf16>, vector<32x96xbf16>, vector<8x96xf32> -> vector<8x96xf32>
    %c0_4 = arith.constant 0 : index
    %c0_5 = arith.constant 0 : index
    %10 = vector.load %arg5[%c0_4, %c0_5] : memref<1x96xf32, #tpu.memory_space<vmem>>, vector<1x96xf32>
    %11 = vector.broadcast %10 : vector<1x96xf32> to vector<8x96xf32>
    %12 = arith.addf %9, %11 : vector<8x96xf32>
    %13 = vector.extract_strided_slice %12 {offsets = [0, 0], sizes = [8, 32], strides = [1, 1]} : vector<8x96xf32> to vector<8x32xf32>
    %14 = vector.extract_strided_slice %12 {offsets = [0, 32], sizes = [8, 32], strides = [1, 1]} : vector<8x96xf32> to vector<8x32xf32>
    %15 = vector.extract_strided_slice %12 {offsets = [0, 64], sizes = [8, 32], strides = [1, 1]} : vector<8x96xf32> to vector<8x32xf32>
    %16 = vector.extract_strided_slice %13 {offsets = [0, 0], sizes = [8, 8], strides = [1, 1]} : vector<8x32xf32> to vector<8x8xf32>
    %17 = arith.truncf %16 : vector<8x8xf32> to vector<8x8xbf16>
    %18 = vector.extract_strided_slice %14 {offsets = [0, 0], sizes = [8, 8], strides = [1, 1]} : vector<8x32xf32> to vector<8x8xf32>
    %19 = arith.truncf %18 : vector<8x8xf32> to vector<8x8xbf16>
    %20 = vector.extract_strided_slice %15 {offsets = [0, 0], sizes = [8, 8], strides = [1, 1]} : vector<8x32xf32> to vector<8x8xf32>
    %21 = arith.truncf %20 : vector<8x8xf32> to vector<8x8xbf16>
    %cst_6 = arith.constant dense<0.000000e+00> : vector<8x8xf32>
    %22 = tpu.matmul %17, %19, %cst_6 {dimension_numbers = #tpu.dot_dimension_numbers<[1], [1], [0], [0], [0, 0, 1, 0], [], []>} : vector<8x8xbf16>, vector<8x8xbf16>, vector<8x8xf32> -> vector<8x8xf32>
    %cst_7 = arith.constant -1.000000e+30 : f32
    %23 = vector.broadcast %cst_7 : f32 to vector<8x8xf32>
    %24 = arith.select %7, %22, %23 : vector<8x8xi1>, vector<8x8xf32>
    %cst_8 = arith.constant dense<0xFF800000> : vector<8xf32>
    %25 = vector.multi_reduction <maximumf>, %24, %cst_8 [1] : vector<8x8xf32> to vector<8xf32>
    %26 = vector.shape_cast %25 : vector<8xf32> to vector<8x1xf32>
    %27 = vector.broadcast %26 : vector<8x1xf32> to vector<8x8xf32>
    %28 = arith.subf %24, %27 : vector<8x8xf32>
    %29 = math.exp %28 : vector<8x8xf32>
    %cst_9 = arith.constant dense<0.000000e+00> : vector<8xf32>
    %30 = vector.multi_reduction <add>, %29, %cst_9 [1] : vector<8x8xf32> to vector<8xf32>
    %31 = vector.shape_cast %30 : vector<8xf32> to vector<8x1xf32>
    %32 = tpu.reciprocal %31 {approx = true} : vector<8x1xf32> -> vector<8x1xf32>
    %33 = vector.broadcast %32 : vector<8x1xf32> to vector<8x8xf32>
    %34 = arith.mulf %29, %33 : vector<8x8xf32>
    %35 = arith.truncf %34 : vector<8x8xf32> to vector<8x8xbf16>
    %cst_10 = arith.constant dense<0.000000e+00> : vector<8x8xf32>
    %36 = tpu.matmul %35, %21, %cst_10 {dimension_numbers = #tpu.dot_dimension_numbers<[1], [0], [0], [1], [0, 0, 1, 1], [], []>} : vector<8x8xbf16>, vector<8x8xbf16>, vector<8x8xf32> -> vector<8x8xf32>
    %c0_11 = arith.constant 0 : index
    %c0_12 = arith.constant 0 : index
    %37 = vector.load %arg16[%c0_11, %c0_12] : memref<8x32xf32, #tpu.memory_space<vmem>>, vector<8x8xf32>
    tpu.vector_store %arg16[%c0_11, %c0_12], %36 {strides = array<i32>} : memref<8x32xf32, #tpu.memory_space<vmem>>, vector<8x8xf32>,
    %38 = vector.extract_strided_slice %13 {offsets = [0, 8], sizes = [8, 8], strides = [1, 1]} : vector<8x32xf32> to vector<8x8xf32>
    %39 = arith.truncf %38 : vector<8x8xf32> to vector<8x8xbf16>
    %40 = vector.extract_strided_slice %14 {offsets = [0, 8], sizes = [8, 8], strides = [1, 1]} : vector<8x32xf32> to vector<8x8xf32>
    %41 = arith.truncf %40 : vector<8x8xf32> to vector<8x8xbf16>
    %42 = vector.extract_strided_slice %15 {offsets = [0, 8], sizes = [8, 8], strides = [1, 1]} : vector<8x32xf32> to vector<8x8xf32>
    %43 = arith.truncf %42 : vector<8x8xf32> to vector<8x8xbf16>
    %cst_13 = arith.constant dense<0.000000e+00> : vector<8x8xf32>
    %44 = tpu.matmul %39, %41, %cst_13 {dimension_numbers = #tpu.dot_dimension_numbers<[1], [1], [0], [0], [0, 0, 1, 0], [], []>} : vector<8x8xbf16>, vector<8x8xbf16>, vector<8x8xf32> -> vector<8x8xf32>
    %cst_14 = arith.constant -1.000000e+30 : f32
    %45 = vector.broadcast %cst_14 : f32 to vector<8x8xf32>
    %46 = arith.select %7, %44, %45 : vector<8x8xi1>, vector<8x8xf32>
    %cst_15 = arith.constant dense<0xFF800000> : vector<8xf32>
    %47 = vector.multi_reduction <maximumf>, %46, %cst_15 [1] : vector<8x8xf32> to vector<8xf32>
    %48 = vector.shape_cast %47 : vector<8xf32> to vector<8x1xf32>
    %49 = vector.broadcast %48 : vector<8x1xf32> to vector<8x8xf32>
    %50 = arith.subf %46, %49 : vector<8x8xf32>
    %51 = math.exp %50 : vector<8x8xf32>
    %cst_16 = arith.constant dense<0.000000e+00> : vector<8xf32>
    %52 = vector.multi_reduction <add>, %51, %cst_16 [1] : vector<8x8xf32> to vector<8xf32>
    %53 = vector.shape_cast %52 : vector<8xf32> to vector<8x1xf32>
    %54 = tpu.reciprocal %53 {approx = true} : vector<8x1xf32> -> vector<8x1xf32>
    %55 = vector.broadcast %54 : vector<8x1xf32> to vector<8x8xf32>
    %56 = arith.mulf %51, %55 : vector<8x8xf32>
    %57 = arith.truncf %56 : vector<8x8xf32> to vector<8x8xbf16>
    %cst_17 = arith.constant dense<0.000000e+00> : vector<8x8xf32>
    %58 = tpu.matmul %57, %43, %cst_17 {dimension_numbers = #tpu.dot_dimension_numbers<[1], [0], [0], [1], [0, 0, 1, 1], [], []>} : vector<8x8xbf16>, vector<8x8xbf16>, vector<8x8xf32> -> vector<8x8xf32>
    %c0_18 = arith.constant 0 : index
    %c8 = arith.constant 8 : index
    %59 = vector.load %arg16[%c0_18, %c8] : memref<8x32xf32, #tpu.memory_space<vmem>>, vector<8x8xf32>
    tpu.vector_store %arg16[%c0_18, %c8], %58 {strides = array<i32>} : memref<8x32xf32, #tpu.memory_space<vmem>>, vector<8x8xf32>,
    %60 = vector.extract_strided_slice %13 {offsets = [0, 16], sizes = [8, 8], strides = [1, 1]} : vector<8x32xf32> to vector<8x8xf32>
    %61 = arith.truncf %60 : vector<8x8xf32> to vector<8x8xbf16>
    %62 = vector.extract_strided_slice %14 {offsets = [0, 16], sizes = [8, 8], strides = [1, 1]} : vector<8x32xf32> to vector<8x8xf32>
    %63 = arith.truncf %62 : vector<8x8xf32> to vector<8x8xbf16>
    %64 = vector.extract_strided_slice %15 {offsets = [0, 16], sizes = [8, 8], strides = [1, 1]} : vector<8x32xf32> to vector<8x8xf32>
    %65 = arith.truncf %64 : vector<8x8xf32> to vector<8x8xbf16>
    %cst_19 = arith.constant dense<0.000000e+00> : vector<8x8xf32>
    %66 = tpu.matmul %61, %63, %cst_19 {dimension_numbers = #tpu.dot_dimension_numbers<[1], [1], [0], [0], [0, 0, 1, 0], [], []>} : vector<8x8xbf16>, vector<8x8xbf16>, vector<8x8xf32> -> vector<8x8xf32>
    %cst_20 = arith.constant -1.000000e+30 : f32
    %67 = vector.broadcast %cst_20 : f32 to vector<8x8xf32>
    %68 = arith.select %7, %66, %67 : vector<8x8xi1>, vector<8x8xf32>
    %cst_21 = arith.constant dense<0xFF800000> : vector<8xf32>
    %69 = vector.multi_reduction <maximumf>, %68, %cst_21 [1] : vector<8x8xf32> to vector<8xf32>
    %70 = vector.shape_cast %69 : vector<8xf32> to vector<8x1xf32>
    %71 = vector.broadcast %70 : vector<8x1xf32> to vector<8x8xf32>
    %72 = arith.subf %68, %71 : vector<8x8xf32>
    %73 = math.exp %72 : vector<8x8xf32>
    %cst_22 = arith.constant dense<0.000000e+00> : vector<8xf32>
    %74 = vector.multi_reduction <add>, %73, %cst_22 [1] : vector<8x8xf32> to vector<8xf32>
    %75 = vector.shape_cast %74 : vector<8xf32> to vector<8x1xf32>
    %76 = tpu.reciprocal %75 {approx = true} : vector<8x1xf32> -> vector<8x1xf32>
    %77 = vector.broadcast %76 : vector<8x1xf32> to vector<8x8xf32>
    %78 = arith.mulf %73, %77 : vector<8x8xf32>
    %79 = arith.truncf %78 : vector<8x8xf32> to vector<8x8xbf16>
    %cst_23 = arith.constant dense<0.000000e+00> : vector<8x8xf32>
    %80 = tpu.matmul %79, %65, %cst_23 {dimension_numbers = #tpu.dot_dimension_numbers<[1], [0], [0], [1], [0, 0, 1, 1], [], []>} : vector<8x8xbf16>, vector<8x8xbf16>, vector<8x8xf32> -> vector<8x8xf32>
    %c0_24 = arith.constant 0 : index
    %c16 = arith.constant 16 : index
    %81 = vector.load %arg16[%c0_24, %c16] : memref<8x32xf32, #tpu.memory_space<vmem>>, vector<8x8xf32>
    tpu.vector_store %arg16[%c0_24, %c16], %80 {strides = array<i32>} : memref<8x32xf32, #tpu.memory_space<vmem>>, vector<8x8xf32>,
    %82 = vector.extract_strided_slice %13 {offsets = [0, 24], sizes = [8, 8], strides = [1, 1]} : vector<8x32xf32> to vector<8x8xf32>
    %83 = arith.truncf %82 : vector<8x8xf32> to vector<8x8xbf16>
    %84 = vector.extract_strided_slice %14 {offsets = [0, 24], sizes = [8, 8], strides = [1, 1]} : vector<8x32xf32> to vector<8x8xf32>
    %85 = arith.truncf %84 : vector<8x8xf32> to vector<8x8xbf16>
    %86 = vector.extract_strided_slice %15 {offsets = [0, 24], sizes = [8, 8], strides = [1, 1]} : vector<8x32xf32> to vector<8x8xf32>
    %87 = arith.truncf %86 : vector<8x8xf32> to vector<8x8xbf16>
    %cst_25 = arith.constant dense<0.000000e+00> : vector<8x8xf32>
    %88 = tpu.matmul %83, %85, %cst_25 {dimension_numbers = #tpu.dot_dimension_numbers<[1], [1], [0], [0], [0, 0, 1, 0], [], []>} : vector<8x8xbf16>, vector<8x8xbf16>, vector<8x8xf32> -> vector<8x8xf32>
    %cst_26 = arith.constant -1.000000e+30 : f32
    %89 = vector.broadcast %cst_26 : f32 to vector<8x8xf32>
    %90 = arith.select %7, %88, %89 : vector<8x8xi1>, vector<8x8xf32>
    %cst_27 = arith.constant dense<0xFF800000> : vector<8xf32>
    %91 = vector.multi_reduction <maximumf>, %90, %cst_27 [1] : vector<8x8xf32> to vector<8xf32>
    %92 = vector.shape_cast %91 : vector<8xf32> to vector<8x1xf32>
    %93 = vector.broadcast %92 : vector<8x1xf32> to vector<8x8xf32>
    %94 = arith.subf %90, %93 : vector<8x8xf32>
    %95 = math.exp %94 : vector<8x8xf32>
    %cst_28 = arith.constant dense<0.000000e+00> : vector<8xf32>
    %96 = vector.multi_reduction <add>, %95, %cst_28 [1] : vector<8x8xf32> to vector<8xf32>
    %97 = vector.shape_cast %96 : vector<8xf32> to vector<8x1xf32>
    %98 = tpu.reciprocal %97 {approx = true} : vector<8x1xf32> -> vector<8x1xf32>
    %99 = vector.broadcast %98 : vector<8x1xf32> to vector<8x8xf32>
    %100 = arith.mulf %95, %99 : vector<8x8xf32>
    %101 = arith.truncf %100 : vector<8x8xf32> to vector<8x8xbf16>
    %cst_29 = arith.constant dense<0.000000e+00> : vector<8x8xf32>
    %102 = tpu.matmul %101, %87, %cst_29 {dimension_numbers = #tpu.dot_dimension_numbers<[1], [0], [0], [1], [0, 0, 1, 1], [], []>} : vector<8x8xbf16>, vector<8x8xbf16>, vector<8x8xf32> -> vector<8x8xf32>
    %c0_30 = arith.constant 0 : index
    %c24 = arith.constant 24 : index
    %103 = vector.load %arg16[%c0_30, %c24] : memref<8x32xf32, #tpu.memory_space<vmem>>, vector<8x8xf32>
    tpu.vector_store %arg16[%c0_30, %c24], %102 {strides = array<i32>} : memref<8x32xf32, #tpu.memory_space<vmem>>, vector<8x8xf32>,
    %c0_31 = arith.constant 0 : index
    %c0_32 = arith.constant 0 : index
    %104 = vector.load %arg16[%c0_31, %c0_32] : memref<8x32xf32, #tpu.memory_space<vmem>>, vector<8x32xf32>
    %105 = arith.truncf %104 : vector<8x32xf32> to vector<8x32xbf16>
    %c0_33 = arith.constant 0 : index
    %c0_34 = arith.constant 0 : index
    %106 = vector.load %arg6[%c0_33, %c0_34] : memref<32x32xbf16, #tpu.memory_space<vmem>>, vector<32x32xbf16>
    %cst_35 = arith.constant dense<0.000000e+00> : vector<8x32xf32>
    %107 = tpu.matmul %105, %106, %cst_35 {dimension_numbers = #tpu.dot_dimension_numbers<[1], [0], [0], [1], [0, 0, 1, 1], [], []>} : vector<8x32xbf16>, vector<32x32xbf16>, vector<8x32xf32> -> vector<8x32xf32>
    %c0_36 = arith.constant 0 : index
    %c0_37 = arith.constant 0 : index
    %108 = vector.load %arg14[%c0_36, %c0_37] : memref<10x32xf32, #tpu.memory_space<vmem>>, vector<1x32xf32>
    %109 = vector.broadcast %108 : vector<1x32xf32> to vector<8x32xf32>
    %110 = arith.addf %107, %109 : vector<8x32xf32>
    %c1 = arith.constant 1 : index
    %c0_38 = arith.constant 0 : index
    %111 = vector.load %arg14[%c1, %c0_38] : memref<10x32xf32, #tpu.memory_space<vmem>>, vector<1x32xf32>
    %c2 = arith.constant 2 : index
    %c0_39 = arith.constant 0 : index
    %112 = vector.load %arg14[%c2, %c0_39] : memref<10x32xf32, #tpu.memory_space<vmem>>, vector<1x32xf32>
    %113 = arith.addf %2, %110 : vector<8x32xf32>
    %cst_40 = arith.constant dense<0.000000e+00> : vector<8xf32>
    %114 = vector.multi_reduction <add>, %113, %cst_40 [1] : vector<8x32xf32> to vector<8xf32>
    %115 = vector.shape_cast %114 : vector<8xf32> to vector<8x1xf32>
    %cst_41 = arith.constant 3.200000e+01 : f32
    %116 = vector.broadcast %cst_41 : f32 to vector<8x1xf32>
    %117 = arith.divf %115, %116 : vector<8x1xf32>
    %118 = vector.broadcast %117 : vector<8x1xf32> to vector<8x32xf32>
    %119 = arith.subf %113, %118 : vector<8x32xf32>
    %120 = arith.mulf %119, %119 : vector<8x32xf32>
    %cst_42 = arith.constant dense<0.000000e+00> : vector<8xf32>
    %121 = vector.multi_reduction <add>, %120, %cst_42 [1] : vector<8x32xf32> to vector<8xf32>
    %122 = vector.shape_cast %121 : vector<8xf32> to vector<8x1xf32>
    %cst_43 = arith.constant 3.200000e+01 : f32
    %123 = vector.broadcast %cst_43 : f32 to vector<8x1xf32>
    %124 = arith.divf %122, %123 : vector<8x1xf32>
    %125 = vector.broadcast %117 : vector<8x1xf32> to vector<8x32xf32>
    %126 = arith.subf %113, %125 : vector<8x32xf32>
    %cst_44 = arith.constant 9.99999974E-6 : f32
    %127 = vector.broadcast %cst_44 : f32 to vector<8x1xf32>
    %128 = arith.addf %124, %127 : vector<8x1xf32>
    %129 = math.rsqrt %128 : vector<8x1xf32>
    %130 = vector.broadcast %129 : vector<8x1xf32> to vector<8x32xf32>
    %131 = arith.mulf %126, %130 : vector<8x32xf32>
    %132 = vector.broadcast %111 : vector<1x32xf32> to vector<8x32xf32>
    %133 = arith.mulf %131, %132 : vector<8x32xf32>
    %134 = vector.broadcast %112 : vector<1x32xf32> to vector<8x32xf32>
    %135 = arith.addf %133, %134 : vector<8x32xf32>
    %136 = arith.truncf %135 : vector<8x32xf32> to vector<8x32xbf16>
    %c0_45 = arith.constant 0 : index
    %c0_46 = arith.constant 0 : index
    %137 = vector.load %arg7[%c0_45, %c0_46] : memref<32x32xbf16, #tpu.memory_space<vmem>>, vector<32x32xbf16>
    %cst_47 = arith.constant dense<0.000000e+00> : vector<8x32xf32>
    %138 = tpu.matmul %136, %137, %cst_47 {dimension_numbers = #tpu.dot_dimension_numbers<[1], [0], [0], [1], [0, 0, 1, 1], [], []>} : vector<8x32xbf16>, vector<32x32xbf16>, vector<8x32xf32> -> vector<8x32xf32>
    %c3 = arith.constant 3 : index
    %c0_48 = arith.constant 0 : index
    %139 = vector.load %arg14[%c3, %c0_48] : memref<10x32xf32, #tpu.memory_space<vmem>>, vector<1x32xf32>
    %140 = vector.broadcast %139 : vector<1x32xf32> to vector<8x32xf32>
    %141 = arith.addf %138, %140 : vector<8x32xf32>
    %c0_49 = arith.constant 0 : index
    %c0_50 = arith.constant 0 : index
    %c0_51 = arith.constant 0 : index
    %142 = vector.load %arg3[%c0_49, %c0_50, %c0_51] : memref<1x16x32xbf16, #tpu.memory_space<vmem>>, vector<1x16x32xbf16>
    %143 = vector.shape_cast %142 : vector<1x16x32xbf16> to vector<16x32xbf16>
    %c0_52 = arith.constant 0 : index
    %c0_53 = arith.constant 0 : index
    %144 = vector.load %arg8[%c0_52, %c0_53] : memref<32x64xbf16, #tpu.memory_space<vmem>>, vector<32x64xbf16>
    %cst_54 = arith.constant dense<0.000000e+00> : vector<16x64xf32>
    %145 = tpu.matmul %143, %144, %cst_54 {dimension_numbers = #tpu.dot_dimension_numbers<[1], [0], [0], [1], [0, 0, 1, 1], [], []>} : vector<16x32xbf16>, vector<32x64xbf16>, vector<16x64xf32> -> vector<16x64xf32>
    %c0_55 = arith.constant 0 : index
    %c0_56 = arith.constant 0 : index
    %146 = vector.load %arg9[%c0_55, %c0_56] : memref<1x64xf32, #tpu.memory_space<vmem>>, vector<1x64xf32>
    %147 = vector.broadcast %146 : vector<1x64xf32> to vector<16x64xf32>
    %148 = arith.addf %145, %147 : vector<16x64xf32>
    %149 = vector.extract_strided_slice %148 {offsets = [0, 0], sizes = [16, 32], strides = [1, 1]} : vector<16x64xf32> to vector<16x32xf32>
    %150 = vector.extract_strided_slice %148 {offsets = [0, 32], sizes = [16, 32], strides = [1, 1]} : vector<16x64xf32> to vector<16x32xf32>
    %151 = vector.extract_strided_slice %141 {offsets = [0, 0], sizes = [8, 8], strides = [1, 1]} : vector<8x32xf32> to vector<8x8xf32>
    %152 = arith.truncf %151 : vector<8x8xf32> to vector<8x8xbf16>
    %153 = vector.extract_strided_slice %149 {offsets = [0, 0], sizes = [16, 8], strides = [1, 1]} : vector<16x32xf32> to vector<16x8xf32>
    %154 = arith.truncf %153 : vector<16x8xf32> to vector<16x8xbf16>
    %155 = vector.extract_strided_slice %150 {offsets = [0, 0], sizes = [16, 8], strides = [1, 1]} : vector<16x32xf32> to vector<16x8xf32>
    %156 = arith.truncf %155 : vector<16x8xf32> to vector<16x8xbf16>
    %cst_57 = arith.constant dense<0.000000e+00> : vector<8x16xf32>
    %157 = tpu.matmul %152, %154, %cst_57 {dimension_numbers = #tpu.dot_dimension_numbers<[1], [1], [0], [0], [0, 0, 1, 0], [], []>} : vector<8x8xbf16>, vector<16x8xbf16>, vector<8x16xf32> -> vector<8x16xf32>
    %cst_58 = arith.constant dense<0xFF800000> : vector<8xf32>
    %158 = vector.multi_reduction <maximumf>, %157, %cst_58 [1] : vector<8x16xf32> to vector<8xf32>
    %159 = vector.shape_cast %158 : vector<8xf32> to vector<8x1xf32>
    %160 = vector.broadcast %159 : vector<8x1xf32> to vector<8x16xf32>
    %161 = arith.subf %157, %160 : vector<8x16xf32>
    %162 = math.exp %161 : vector<8x16xf32>
    %cst_59 = arith.constant dense<0.000000e+00> : vector<8xf32>
    %163 = vector.multi_reduction <add>, %162, %cst_59 [1] : vector<8x16xf32> to vector<8xf32>
    %164 = vector.shape_cast %163 : vector<8xf32> to vector<8x1xf32>
    %165 = tpu.reciprocal %164 {approx = true} : vector<8x1xf32> -> vector<8x1xf32>
    %166 = vector.broadcast %165 : vector<8x1xf32> to vector<8x16xf32>
    %167 = arith.mulf %162, %166 : vector<8x16xf32>
    %168 = arith.truncf %167 : vector<8x16xf32> to vector<8x16xbf16>
    %cst_60 = arith.constant dense<0.000000e+00> : vector<8x8xf32>
    %169 = tpu.matmul %168, %156, %cst_60 {dimension_numbers = #tpu.dot_dimension_numbers<[1], [0], [0], [1], [0, 0, 1, 1], [], []>} : vector<8x16xbf16>, vector<16x8xbf16>, vector<8x8xf32> -> vector<8x8xf32>
    %c0_61 = arith.constant 0 : index
    %c0_62 = arith.constant 0 : index
    %170 = vector.load %arg16[%c0_61, %c0_62] : memref<8x32xf32, #tpu.memory_space<vmem>>, vector<8x8xf32>
    tpu.vector_store %arg16[%c0_61, %c0_62], %169 {strides = array<i32>} : memref<8x32xf32, #tpu.memory_space<vmem>>, vector<8x8xf32>,
    %171 = vector.extract_strided_slice %141 {offsets = [0, 8], sizes = [8, 8], strides = [1, 1]} : vector<8x32xf32> to vector<8x8xf32>
    %172 = arith.truncf %171 : vector<8x8xf32> to vector<8x8xbf16>
    %173 = vector.extract_strided_slice %149 {offsets = [0, 8], sizes = [16, 8], strides = [1, 1]} : vector<16x32xf32> to vector<16x8xf32>
    %174 = arith.truncf %173 : vector<16x8xf32> to vector<16x8xbf16>
    %175 = vector.extract_strided_slice %150 {offsets = [0, 8], sizes = [16, 8], strides = [1, 1]} : vector<16x32xf32> to vector<16x8xf32>
    %176 = arith.truncf %175 : vector<16x8xf32> to vector<16x8xbf16>
    %cst_63 = arith.constant dense<0.000000e+00> : vector<8x16xf32>
    %177 = tpu.matmul %172, %174, %cst_63 {dimension_numbers = #tpu.dot_dimension_numbers<[1], [1], [0], [0], [0, 0, 1, 0], [], []>} : vector<8x8xbf16>, vector<16x8xbf16>, vector<8x16xf32> -> vector<8x16xf32>
    %cst_64 = arith.constant dense<0xFF800000> : vector<8xf32>
    %178 = vector.multi_reduction <maximumf>, %177, %cst_64 [1] : vector<8x16xf32> to vector<8xf32>
    %179 = vector.shape_cast %178 : vector<8xf32> to vector<8x1xf32>
    %180 = vector.broadcast %179 : vector<8x1xf32> to vector<8x16xf32>
    %181 = arith.subf %177, %180 : vector<8x16xf32>
    %182 = math.exp %181 : vector<8x16xf32>
    %cst_65 = arith.constant dense<0.000000e+00> : vector<8xf32>
    %183 = vector.multi_reduction <add>, %182, %cst_65 [1] : vector<8x16xf32> to vector<8xf32>
    %184 = vector.shape_cast %183 : vector<8xf32> to vector<8x1xf32>
    %185 = tpu.reciprocal %184 {approx = true} : vector<8x1xf32> -> vector<8x1xf32>
    %186 = vector.broadcast %185 : vector<8x1xf32> to vector<8x16xf32>
    %187 = arith.mulf %182, %186 : vector<8x16xf32>
    %188 = arith.truncf %187 : vector<8x16xf32> to vector<8x16xbf16>
    %cst_66 = arith.constant dense<0.000000e+00> : vector<8x8xf32>
    %189 = tpu.matmul %188, %176, %cst_66 {dimension_numbers = #tpu.dot_dimension_numbers<[1], [0], [0], [1], [0, 0, 1, 1], [], []>} : vector<8x16xbf16>, vector<16x8xbf16>, vector<8x8xf32> -> vector<8x8xf32>
    %c0_67 = arith.constant 0 : index
    %c8_68 = arith.constant 8 : index
    %190 = vector.load %arg16[%c0_67, %c8_68] : memref<8x32xf32, #tpu.memory_space<vmem>>, vector<8x8xf32>
    tpu.vector_store %arg16[%c0_67, %c8_68], %189 {strides = array<i32>} : memref<8x32xf32, #tpu.memory_space<vmem>>, vector<8x8xf32>,
    %191 = vector.extract_strided_slice %141 {offsets = [0, 16], sizes = [8, 8], strides = [1, 1]} : vector<8x32xf32> to vector<8x8xf32>
    %192 = arith.truncf %191 : vector<8x8xf32> to vector<8x8xbf16>
    %193 = vector.extract_strided_slice %149 {offsets = [0, 16], sizes = [16, 8], strides = [1, 1]} : vector<16x32xf32> to vector<16x8xf32>
    %194 = arith.truncf %193 : vector<16x8xf32> to vector<16x8xbf16>
    %195 = vector.extract_strided_slice %150 {offsets = [0, 16], sizes = [16, 8], strides = [1, 1]} : vector<16x32xf32> to vector<16x8xf32>
    %196 = arith.truncf %195 : vector<16x8xf32> to vector<16x8xbf16>
    %cst_69 = arith.constant dense<0.000000e+00> : vector<8x16xf32>
    %197 = tpu.matmul %192, %194, %cst_69 {dimension_numbers = #tpu.dot_dimension_numbers<[1], [1], [0], [0], [0, 0, 1, 0], [], []>} : vector<8x8xbf16>, vector<16x8xbf16>, vector<8x16xf32> -> vector<8x16xf32>
    %cst_70 = arith.constant dense<0xFF800000> : vector<8xf32>
    %198 = vector.multi_reduction <maximumf>, %197, %cst_70 [1] : vector<8x16xf32> to vector<8xf32>
    %199 = vector.shape_cast %198 : vector<8xf32> to vector<8x1xf32>
    %200 = vector.broadcast %199 : vector<8x1xf32> to vector<8x16xf32>
    %201 = arith.subf %197, %200 : vector<8x16xf32>
    %202 = math.exp %201 : vector<8x16xf32>
    %cst_71 = arith.constant dense<0.000000e+00> : vector<8xf32>
    %203 = vector.multi_reduction <add>, %202, %cst_71 [1] : vector<8x16xf32> to vector<8xf32>
    %204 = vector.shape_cast %203 : vector<8xf32> to vector<8x1xf32>
    %205 = tpu.reciprocal %204 {approx = true} : vector<8x1xf32> -> vector<8x1xf32>
    %206 = vector.broadcast %205 : vector<8x1xf32> to vector<8x16xf32>
    %207 = arith.mulf %202, %206 : vector<8x16xf32>
    %208 = arith.truncf %207 : vector<8x16xf32> to vector<8x16xbf16>
    %cst_72 = arith.constant dense<0.000000e+00> : vector<8x8xf32>
    %209 = tpu.matmul %208, %196, %cst_72 {dimension_numbers = #tpu.dot_dimension_numbers<[1], [0], [0], [1], [0, 0, 1, 1], [], []>} : vector<8x16xbf16>, vector<16x8xbf16>, vector<8x8xf32> -> vector<8x8xf32>
    %c0_73 = arith.constant 0 : index
    %c16_74 = arith.constant 16 : index
    %210 = vector.load %arg16[%c0_73, %c16_74] : memref<8x32xf32, #tpu.memory_space<vmem>>, vector<8x8xf32>
    tpu.vector_store %arg16[%c0_73, %c16_74], %209 {strides = array<i32>} : memref<8x32xf32, #tpu.memory_space<vmem>>, vector<8x8xf32>,
    %211 = vector.extract_strided_slice %141 {offsets = [0, 24], sizes = [8, 8], strides = [1, 1]} : vector<8x32xf32> to vector<8x8xf32>
    %212 = arith.truncf %211 : vector<8x8xf32> to vector<8x8xbf16>
    %213 = vector.extract_strided_slice %149 {offsets = [0, 24], sizes = [16, 8], strides = [1, 1]} : vector<16x32xf32> to vector<16x8xf32>
    %214 = arith.truncf %213 : vector<16x8xf32> to vector<16x8xbf16>
    %215 = vector.extract_strided_slice %150 {offsets = [0, 24], sizes = [16, 8], strides = [1, 1]} : vector<16x32xf32> to vector<16x8xf32>
    %216 = arith.truncf %215 : vector<16x8xf32> to vector<16x8xbf16>
    %cst_75 = arith.constant dense<0.000000e+00> : vector<8x16xf32>
    %217 = tpu.matmul %212, %214, %cst_75 {dimension_numbers = #tpu.dot_dimension_numbers<[1], [1], [0], [0], [0, 0, 1, 0], [], []>} : vector<8x8xbf16>, vector<16x8xbf16>, vector<8x16xf32> -> vector<8x16xf32>
    %cst_76 = arith.constant dense<0xFF800000> : vector<8xf32>
    %218 = vector.multi_reduction <maximumf>, %217, %cst_76 [1] : vector<8x16xf32> to vector<8xf32>
    %219 = vector.shape_cast %218 : vector<8xf32> to vector<8x1xf32>
    %220 = vector.broadcast %219 : vector<8x1xf32> to vector<8x16xf32>
    %221 = arith.subf %217, %220 : vector<8x16xf32>
    %222 = math.exp %221 : vector<8x16xf32>
    %cst_77 = arith.constant dense<0.000000e+00> : vector<8xf32>
    %223 = vector.multi_reduction <add>, %222, %cst_77 [1] : vector<8x16xf32> to vector<8xf32>
    %224 = vector.shape_cast %223 : vector<8xf32> to vector<8x1xf32>
    %225 = tpu.reciprocal %224 {approx = true} : vector<8x1xf32> -> vector<8x1xf32>
    %226 = vector.broadcast %225 : vector<8x1xf32> to vector<8x16xf32>
    %227 = arith.mulf %222, %226 : vector<8x16xf32>
    %228 = arith.truncf %227 : vector<8x16xf32> to vector<8x16xbf16>
    %cst_78 = arith.constant dense<0.000000e+00> : vector<8x8xf32>
    %229 = tpu.matmul %228, %216, %cst_78 {dimension_numbers = #tpu.dot_dimension_numbers<[1], [0], [0], [1], [0, 0, 1, 1], [], []>} : vector<8x16xbf16>, vector<16x8xbf16>, vector<8x8xf32> -> vector<8x8xf32>
    %c0_79 = arith.constant 0 : index
    %c24_80 = arith.constant 24 : index
    %230 = vector.load %arg16[%c0_79, %c24_80] : memref<8x32xf32, #tpu.memory_space<vmem>>, vector<8x8xf32>
    tpu.vector_store %arg16[%c0_79, %c24_80], %229 {strides = array<i32>} : memref<8x32xf32, #tpu.memory_space<vmem>>, vector<8x8xf32>,
    %c0_81 = arith.constant 0 : index
    %c0_82 = arith.constant 0 : index
    %231 = vector.load %arg16[%c0_81, %c0_82] : memref<8x32xf32, #tpu.memory_space<vmem>>, vector<8x32xf32>
    %232 = arith.truncf %231 : vector<8x32xf32> to vector<8x32xbf16>
    %c0_83 = arith.constant 0 : index
    %c0_84 = arith.constant 0 : index
    %233 = vector.load %arg10[%c0_83, %c0_84] : memref<32x32xbf16, #tpu.memory_space<vmem>>, vector<32x32xbf16>
    %cst_85 = arith.constant dense<0.000000e+00> : vector<8x32xf32>
    %234 = tpu.matmul %232, %233, %cst_85 {dimension_numbers = #tpu.dot_dimension_numbers<[1], [0], [0], [1], [0, 0, 1, 1], [], []>} : vector<8x32xbf16>, vector<32x32xbf16>, vector<8x32xf32> -> vector<8x32xf32>
    %c4 = arith.constant 4 : index
    %c0_86 = arith.constant 0 : index
    %235 = vector.load %arg14[%c4, %c0_86] : memref<10x32xf32, #tpu.memory_space<vmem>>, vector<1x32xf32>
    %236 = vector.broadcast %235 : vector<1x32xf32> to vector<8x32xf32>
    %237 = arith.addf %234, %236 : vector<8x32xf32>
    %c5 = arith.constant 5 : index
    %c0_87 = arith.constant 0 : index
    %238 = vector.load %arg14[%c5, %c0_87] : memref<10x32xf32, #tpu.memory_space<vmem>>, vector<1x32xf32>
    %c6 = arith.constant 6 : index
    %c0_88 = arith.constant 0 : index
    %239 = vector.load %arg14[%c6, %c0_88] : memref<10x32xf32, #tpu.memory_space<vmem>>, vector<1x32xf32>
    %240 = arith.addf %135, %237 : vector<8x32xf32>
    %cst_89 = arith.constant dense<0.000000e+00> : vector<8xf32>
    %241 = vector.multi_reduction <add>, %240, %cst_89 [1] : vector<8x32xf32> to vector<8xf32>
    %242 = vector.shape_cast %241 : vector<8xf32> to vector<8x1xf32>
    %cst_90 = arith.constant 3.200000e+01 : f32
    %243 = vector.broadcast %cst_90 : f32 to vector<8x1xf32>
    %244 = arith.divf %242, %243 : vector<8x1xf32>
    %245 = vector.broadcast %244 : vector<8x1xf32> to vector<8x32xf32>
    %246 = arith.subf %240, %245 : vector<8x32xf32>
    %247 = arith.mulf %246, %246 : vector<8x32xf32>
    %cst_91 = arith.constant dense<0.000000e+00> : vector<8xf32>
    %248 = vector.multi_reduction <add>, %247, %cst_91 [1] : vector<8x32xf32> to vector<8xf32>
    %249 = vector.shape_cast %248 : vector<8xf32> to vector<8x1xf32>
    %cst_92 = arith.constant 3.200000e+01 : f32
    %250 = vector.broadcast %cst_92 : f32 to vector<8x1xf32>
    %251 = arith.divf %249, %250 : vector<8x1xf32>
    %252 = vector.broadcast %244 : vector<8x1xf32> to vector<8x32xf32>
    %253 = arith.subf %240, %252 : vector<8x32xf32>
    %cst_93 = arith.constant 9.99999974E-6 : f32
    %254 = vector.broadcast %cst_93 : f32 to vector<8x1xf32>
    %255 = arith.addf %251, %254 : vector<8x1xf32>
    %256 = math.rsqrt %255 : vector<8x1xf32>
    %257 = vector.broadcast %256 : vector<8x1xf32> to vector<8x32xf32>
    %258 = arith.mulf %253, %257 : vector<8x32xf32>
    %259 = vector.broadcast %238 : vector<1x32xf32> to vector<8x32xf32>
    %260 = arith.mulf %258, %259 : vector<8x32xf32>
    %261 = vector.broadcast %239 : vector<1x32xf32> to vector<8x32xf32>
    %262 = arith.addf %260, %261 : vector<8x32xf32>
    %263 = arith.truncf %262 : vector<8x32xf32> to vector<8x32xbf16>
    %c0_94 = arith.constant 0 : index
    %c0_95 = arith.constant 0 : index
    %264 = vector.load %arg11[%c0_94, %c0_95] : memref<32x128xbf16, #tpu.memory_space<vmem>>, vector<32x128xbf16>
    %cst_96 = arith.constant dense<0.000000e+00> : vector<8x128xf32>
    %265 = tpu.matmul %263, %264, %cst_96 {dimension_numbers = #tpu.dot_dimension_numbers<[1], [0], [0], [1], [0, 0, 1, 1], [], []>} : vector<8x32xbf16>, vector<32x128xbf16>, vector<8x128xf32> -> vector<8x128xf32>
    %c0_97 = arith.constant 0 : index
    %c0_98 = arith.constant 0 : index
    %266 = vector.load %arg12[%c0_97, %c0_98] : memref<1x128xf32, #tpu.memory_space<vmem>>, vector<1x128xf32>
    %267 = vector.broadcast %266 : vector<1x128xf32> to vector<8x128xf32>
    %268 = arith.addf %265, %267 : vector<8x128xf32>
    %cst_99 = arith.constant 0.000000e+00 : f32
    %269 = vector.broadcast %cst_99 : f32 to vector<8x128xf32>
    %270 = arith.maximumf %268, %269 : vector<8x128xf32>
    %271 = arith.truncf %270 : vector<8x128xf32> to vector<8x128xbf16>
    %c0_100 = arith.constant 0 : index
    %c0_101 = arith.constant 0 : index
    %272 = vector.load %arg13[%c0_100, %c0_101] : memref<128x32xbf16, #tpu.memory_space<vmem>>, vector<128x32xbf16>
    %cst_102 = arith.constant dense<0.000000e+00> : vector<8x32xf32>
    %273 = tpu.matmul %271, %272, %cst_102 {dimension_numbers = #tpu.dot_dimension_numbers<[1], [0], [0], [1], [0, 0, 1, 1], [], []>} : vector<8x128xbf16>, vector<128x32xbf16>, vector<8x32xf32> -> vector<8x32xf32>
    %c7 = arith.constant 7 : index
    %c0_103 = arith.constant 0 : index
    %274 = vector.load %arg14[%c7, %c0_103] : memref<10x32xf32, #tpu.memory_space<vmem>>, vector<1x32xf32>
    %275 = vector.broadcast %274 : vector<1x32xf32> to vector<8x32xf32>
    %276 = arith.addf %273, %275 : vector<8x32xf32>
    %c8_104 = arith.constant 8 : index
    %c0_105 = arith.constant 0 : index
    %277 = vector.load %arg14[%c8_104, %c0_105] : memref<10x32xf32, #tpu.memory_space<vmem>>, vector<1x32xf32>
    %c9 = arith.constant 9 : index
    %c0_106 = arith.constant 0 : index
    %278 = vector.load %arg14[%c9, %c0_106] : memref<10x32xf32, #tpu.memory_space<vmem>>, vector<1x32xf32>
    %279 = arith.addf %262, %276 : vector<8x32xf32>
    %cst_107 = arith.constant dense<0.000000e+00> : vector<8xf32>
    %280 = vector.multi_reduction <add>, %279, %cst_107 [1] : vector<8x32xf32> to vector<8xf32>
    %281 = vector.shape_cast %280 : vector<8xf32> to vector<8x1xf32>
    %cst_108 = arith.constant 3.200000e+01 : f32
    %282 = vector.broadcast %cst_108 : f32 to vector<8x1xf32>
    %283 = arith.divf %281, %282 : vector<8x1xf32>
    %284 = vector.broadcast %283 : vector<8x1xf32> to vector<8x32xf32>
    %285 = arith.subf %279, %284 : vector<8x32xf32>
    %286 = arith.mulf %285, %285 : vector<8x32xf32>
    %cst_109 = arith.constant dense<0.000000e+00> : vector<8xf32>
    %287 = vector.multi_reduction <add>, %286, %cst_109 [1] : vector<8x32xf32> to vector<8xf32>
    %288 = vector.shape_cast %287 : vector<8xf32> to vector<8x1xf32>
    %cst_110 = arith.constant 3.200000e+01 : f32
    %289 = vector.broadcast %cst_110 : f32 to vector<8x1xf32>
    %290 = arith.divf %288, %289 : vector<8x1xf32>
    %291 = vector.broadcast %283 : vector<8x1xf32> to vector<8x32xf32>
    %292 = arith.subf %279, %291 : vector<8x32xf32>
    %cst_111 = arith.constant 9.99999974E-6 : f32
    %293 = vector.broadcast %cst_111 : f32 to vector<8x1xf32>
    %294 = arith.addf %290, %293 : vector<8x1xf32>
    %295 = math.rsqrt %294 : vector<8x1xf32>
    %296 = vector.broadcast %295 : vector<8x1xf32> to vector<8x32xf32>
    %297 = arith.mulf %292, %296 : vector<8x32xf32>
    %298 = vector.broadcast %277 : vector<1x32xf32> to vector<8x32xf32>
    %299 = arith.mulf %297, %298 : vector<8x32xf32>
    %300 = vector.broadcast %278 : vector<1x32xf32> to vector<8x32xf32>
    %301 = arith.addf %299, %300 : vector<8x32xf32>
    %302 = arith.truncf %301 : vector<8x32xf32> to vector<8x32xbf16>
    %c0_112 = arith.constant 0 : index
    %c0_113 = arith.constant 0 : index
    %c0_114 = arith.constant 0 : index
    %303 = vector.load %arg15[%c0_112, %c0_113, %c0_114] : memref<1x8x32xbf16, #tpu.memory_space<vmem>>, vector<1x8x32xbf16>
    %304 = vector.shape_cast %303 : vector<1x8x32xbf16> to vector<8x32xbf16>
    %305 = vector.shape_cast %302 : vector<8x32xbf16> to vector<1x8x32xbf16>
    tpu.vector_store %arg15[%c0_112, %c0_113, %c0_114], %305 {strides = array<i32>} : memref<1x8x32xbf16, #tpu.memory_space<vmem>>, vector<1x8x32xbf16>,
    return
  }
  func.func @transform_0(%arg0: i32, %arg1: i32) -> (i32, i32, i32) {
    %c0_i32 = arith.constant 0 : i32
    %c0_i32_0 = arith.constant 0 : i32
    %c0_i32_1 = arith.constant 0 : i32
    return %arg0, %c0_i32, %c0_i32_0 : i32, i32, i32
  }
  func.func @transform_1(%arg0: i32, %arg1: i32) -> (i32, i32, i32) {
    %c0_i32 = arith.constant 0 : i32
    %c0_i32_0 = arith.constant 0 : i32
    %c0_i32_1 = arith.constant 0 : i32
    return %arg0, %c0_i32, %c0_i32_0 : i32, i32, i32
  }
  func.func @transform_2(%arg0: i32, %arg1: i32) -> (i32, i32) {
    %c0_i32 = arith.constant 0 : i32
    %c0_i32_0 = arith.constant 0 : i32
    %c0_i32_1 = arith.constant 0 : i32
    return %c0_i32, %c0_i32_0 : i32, i32
  }
  func.func @transform_3(%arg0: i32, %arg1: i32) -> (i32, i32) {
    %c0_i32 = arith.constant 0 : i32
    %c0_i32_0 = arith.constant 0 : i32
    %c0_i32_1 = arith.constant 0 : i32
    return %c0_i32, %c0_i32_0 : i32, i32
  }
  func.func @transform_4(%arg0: i32, %arg1: i32) -> (i32, i32) {
    %c0_i32 = arith.constant 0 : i32
    %c0_i32_0 = arith.constant 0 : i32
    %c0_i32_1 = arith.constant 0 : i32
    return %c0_i32, %c0_i32_0 : i32, i32
  }
  func.func @transform_5(%arg0: i32, %arg1: i32) -> (i32, i32) {
    %c0_i32 = arith.constant 0 : i32
    %c0_i32_0 = arith.constant 0 : i32
    %c0_i32_1 = arith.constant 0 : i32
    return %c0_i32, %c0_i32_0 : i32, i32
  }
  func.func @transform_6(%arg0: i32, %arg1: i32) -> (i32, i32) {
    %c0_i32 = arith.constant 0 : i32
    %c0_i32_0 = arith.constant 0 : i32
    %c0_i32_1 = arith.constant 0 : i32
    return %c0_i32, %c0_i32_0 : i32, i32
  }
  func.func @transform_7(%arg0: i32, %arg1: i32) -> (i32, i32) {
    %c0_i32 = arith.constant 0 : i32
    %c0_i32_0 = arith.constant 0 : i32
    %c0_i32_1 = arith.constant 0 : i32
    return %c0_i32, %c0_i32_0 : i32, i32
  }
  func.func @transform_8(%arg0: i32, %arg1: i32) -> (i32, i32) {
    %c0_i32 = arith.constant 0 : i32
    %c0_i32_0 = arith.constant 0 : i32
    %c0_i32_1 = arith.constant 0 : i32
    return %c0_i32, %c0_i32_0 : i32, i32
  }
  func.func @transform_9(%arg0: i32, %arg1: i32) -> (i32, i32) {
    %c0_i32 = arith.constant 0 : i32
    %c0_i32_0 = arith.constant 0 : i32
    %c0_i32_1 = arith.constant 0 : i32
    return %c0_i32, %c0_i32_0 : i32, i32
  }
  func.func @transform_10(%arg0: i32, %arg1: i32) -> (i32, i32) {
    %c0_i32 = arith.constant 0 : i32
    %c0_i32_0 = arith.constant 0 : i32
    %c0_i32_1 = arith.constant 0 : i32
    return %c0_i32, %c0_i32_0 : i32, i32
  }
  func.func @transform_11(%arg0: i32, %arg1: i32) -> (i32, i32) {
    %c0_i32 = arith.constant 0 : i32
    %c0_i32_0 = arith.constant 0 : i32
    %c0_i32_1 = arith.constant 0 : i32
    return %c0_i32, %c0_i32_0 : i32, i32
  }
  func.func @transform_12(%arg0: i32, %arg1: i32) -> (i32, i32) {
    %c0_i32 = arith.constant 0 : i32
    %c0_i32_0 = arith.constant 0 : i32
    %c0_i32_1 = arith.constant 0 : i32
    return %c0_i32, %c0_i32_0 : i32, i32
  }
  func.func @transform_13(%arg0: i32, %arg1: i32) -> (i32, i32, i32) {
    %c0_i32 = arith.constant 0 : i32
    %c0_i32_0 = arith.constant 0 : i32
    return %arg0, %arg1, %c0_i32 : i32, i32, i32
  }
}

</mosaic_0001>

<bundles_post_ra>
// kernel: ardecoder_forward.2
= control target key start
LH: loop header
LB: loop body
LE: loop exit
PB: predicated region body
PF: predicated region fallthrough
CT: control target
= control target key end

     0   :  { %s2579_s25 = smov 0   ;;  %s2581_s26 = smov 0   ;;  %s2945_s0 = inlined_call_operand.vmem [shape: bf16[2,8,32], index: 0, kind: input, shape index: {}]   ;;  %s2946_s1 = inlined_call_operand.vmem [shape: bf16[2,16,32], index: 1, kind: input, shape index: {}]   ;;  %s2947_s2 = inlined_call_operand.vmem [shape: bf16[32,96], index: 2, kind: input, shape index: {}]   ;;  %s2948_s3 = inlined_call_operand.vmem [shape: f32[1,96], index: 3, kind: input, shape index: {}]   ;;  %s2949_s4 = inlined_call_operand.vmem [shape: bf16[32,32], index: 4, kind: input, shape index: {}]   ;;  %s2950_s5 = inlined_call_operand.vmem [shape: bf16[32,32], index: 5, kind: input, shape index: {}]   ;;  %s2951_s6 = inlined_call_operand.vmem [shape: bf16[32,64], index: 6, kind: input, shape index: {}]   ;;  %s2952_s7 = inlined_call_operand.vmem [shape: f32[1,64], index: 7, kind: input, shape index: {}]   ;;  %s2953_s8 = inlined_call_operand.vmem [shape: bf16[32,32], index: 8, kind: input, shape index: {}]   ;;  %s2954_s9 = inlined_call_operand.vmem [shape: bf16[32,128], index: 9, kind: input, shape index: {}]   ;;  %s2955_s10 = inlined_call_operand.vmem [shape: f32[1,128], index: 10, kind: input, shape index: {}]   ;;  %s2956_s11 = inlined_call_operand.vmem [shape: bf16[128,32], index: 11, kind: input, shape index: {}]   ;;  %s2957_s12 = inlined_call_operand.vmem [shape: f32[10,32], index: 12, kind: input, shape index: {}]   ;;  %s2958_s13 = inlined_call_operand.vmem [shape: bf16[2,8,32], index: 13, kind: output, shape index: {}]  }
   0x1   :  { %s2583_s27 = smov 0  }
   0x2 LB: > { %s35_s28 = sadd.s32 1, %s2487_s26  ;;  %p2083_p0 = scmp.ge.s32.totalorder %s2491_s27, 1  ;;  %s2491_s27 = sphi %s2583_s27, %s23_s27   ;;  %s2487_s26 = sphi %s2581_s26, %s2970_s26   ;;  %s2483_s25 = sphi %s2579_s25, %s2969_s25  }
   0x3   : > { %p37_p1 = scmp.ge.s32.totalorder %s35_s28, 2  ;;  %p410_p2 = scmp.lt.s32.totalorder %s2491_s27, 3 }
   0x5   : > { %s2972_s28 = smov (%p37_p1, %s35_s28), 0  ;;  %p411_p3 = pnand %p2083_p0, %p410_p2 }
   0x6   : > { %v2410_v0 = vld [vmem:[%s2947_s2] sm:$0xff] (!%p411_p3)   ;;  %v2493_v1 = vmov (!%p411_p3), 0.0   ;;  %v2411_v2 = vld [vmem:[%s2947_s2 + $0x8] sm:$0xff] (!%p411_p3)   ;;  %vm2494_vm0 = vmmov (!%p411_p3), 0   ;;  %p460_p4 = scmp.lt.s32.totalorder (!%p411_p3), %s2483_s25, 1  ;;  %vm507_vm1 = vcmask (!%p411_p3), 261120   ;;  %v479_v15 = vlaneseq (!%p411_p3) }
   0x7   : > { %414 = sbr.rel (%p411_p3) target bundleno = 4853 (0x12f5), region = 72  ;;  %2206 = vmatprep.subr.bf16.mxu1 (!%p411_p3), %v2493_v1  ;;  %2232 = vmatprep.subr.bf16.mxu0 (!%p411_p3), %v2493_v1  ;;  %v2088_v4 = vld [vmem:[%s2948_s3] ss:$0 sm:$0xff] (!%p411_p3)  ;;  %s2495_s30 = smov (!%p411_p3), 64   ;;  %vm555_vm2 = vcmask (!%p411_p3), 64512   ;;  %vm620_vm3 = vcmask (!%p411_p3), 1043456  }
   0x8   : > { %2207 = vmatpush3.bf16.msra.mxu1 (!%p411_p3), %v2410_v0  ;;  %2210 = vmatprep.mubr.msk.bf16.mxu1 (!%p411_p3), %vm2494_vm0, %v2493_v1  ;;  %s2496_s14 = smov (!%p411_p3), 96   ;;  %s2960_s15 = smov (!%p411_p3), 88   ;;  %v2649_v16 = vshrl.u32 (!%p411_p3), %v479_v15, 7  ;;  %v2651_v17 = vand.u32 (!%p411_p3), 127, %v479_v15  ;;  %vm780_vm5 = vcmask (!%p411_p3), 130112   ;;  %vm897_vm6 = vcmask (!%p411_p3), 195712  }
   0x9   : > { %2208 = vmatprep.subr.bf16.mxu1 (!%p411_p3), %v2493_v1  ;;  %2234 = vmatprep.mubr.msk.bf16.mxu0 (!%p411_p3), %vm2494_vm0, %v2493_v1  ;;  %s2499_s18 = smov (!%p411_p3), 120   ;;  %s2500_s19 = smov (!%p411_p3), 80   ;;  %vm1014_vm7 = vcmask (!%p411_p3), 261312   ;;  %vm1296_vm8 = vcmask (!%p411_p3), 130048   ;;  %vm1994_vm9 = vcmask (!%p411_p3), 257024  }
   0xa   : > { %vm483_vm4 = vcmp.le.s32.totalorder (!%p411_p3), %v2651_v17, %v2649_v16  ;;  %s2502_s21 = smov (!%p411_p3), 104   ;;  %s2503_s22 = smov (!%p411_p3), 56  }
   0xb   : > { %s2504_s24 = smov (!%p411_p3), 48   ;;  %s2505_s29 = smov (!%p411_p3), 40  }
   0xc   : > { %2209 = vmatpush3.bf16.msra.mxu1 (!%p411_p3), %v2411_v2 }
   0xd   : > { %2214 = vmatprep.subr.bf16.mxu1 (!%p411_p3), %v2493_v1 }
   0xe   : > { %s2974_s25 = smov (!%p460_p4, %s2483_s25), 1 }
   0xf   : > { %s2959_s16 = sshll.u32 %s2974_s25, 2  ;;  %s2146_s17 = sshll.u32 %s2974_s25, 3 }
  0x10   : > { %s463_s20 = scalar_lea.vmem %s2945_s0, %s2959_s16  ;;  %s2622_s23 = scalar_lea.vmem %s2946_s1, %s2146_s17 }
  0x11   : > { %v2625_v3 = vld [vmem:[%s463_s20] sm:$0xf]  ;;  %s2498_s17 = smov 72   ;;  %s2501_s20 = smov 112  }
  0x12   : > { %2211 = vmatmul.mubr.msk.bf16.vlgmr.msra.gmra.mrb[0].mxu1 %vm507_vm1, %v2625_v3  ;;  %s2966_s16 = smov 16  }
  0x13   : > { %2216 = vmatprep.mubr.msk.bf16.mxu1 %vm2494_vm0, %v2493_v1 }
  0xe5   : > { %v545_v5 = vpop.f32.mrb[0].mxu1 }
  0xe6   : > { %v546_v6 = vadd.f32 %v2088_v4, %v545_v5  ;;  %v2212_v7 = vpop.f32.mrb[1].mxu1 }
  0xe7   : > { %v548_v8 = vpop.f32.mrb[2].mxu1 }
  0xe8   : > { %v2634_v9 = vpack.c.bf16 %v546_v6, %v546_v6  ;;  %v2213_v10 = vpop.f32.mrb[3].mxu1 }
  0xea   : > { %615 = vrot.lane.b32.xlu1 %v2634_v9, %s2495_s30  ;;  %553 = vrot.lane.b32.xlu0 %v2634_v9, %s2496_s14  ;;  %s2963_s30 = smov 8  }
  0xee   : > { %667 = vrot.lane.b32.xlu1 %v2634_v9, %s2960_s15  ;;  %s2962_s15 = smov 16  }
 0x15c   : > { %v554_v11 = vpop.permute.xlu0 %553  ;;  %v616_v13 = vpop.permute.xlu1 %615 }
 0x15d   : > { %v560_v12 = vsel %vm555_vm2, %v554_v11, 0  ;;  %v622_v14 = vsel %vm620_vm3, %v616_v13, 0 }
 0x15e   : > { %2215 = vmatpush3.bf16.xpose.msra.mxu1 %v560_v12 }
 0x15f   : > { %2220 = vmatprep.subr.bf16.mxu1 %v2493_v1 }
 0x160   : > { %v668_v29 = vpop.permute.xlu1 %667 }
 0x161   : > { %v673_v35 = vsel %vm555_vm2, %v668_v29, 0 }
 0x165   : > { %2217 = vmatmul.mubr.msk.bf16.vlgmr.msra.gmra.mrb[4].mxu1 %vm555_vm2, %v2634_v9 }
 0x166   : > { %2221 = vmatpush3.bf16.msra.mxu1 %v622_v14  ;;  %2222 = vmatprep.mubr.msk.bf16.mxu1 %vm2494_vm0, %v2493_v1 }
 0x167   : > { %2226 = vmatprep.subr.bf16.mxu1 %v2493_v1 }
 0x238   : > { %v596_v18 = vpop.f32.mrb[4].mxu1 }
 0x239   : > { %v602_v19 = vsel %vm483_vm4, %v596_v18, -1e+30  ;;  %v2218_v20 = vpop.f32.mrb[5].mxu1 }
 0x23a   : > { %v599_v21 = vpop.f32.mrb[6].mxu1  ;;  %v603_v22 = vsel %vm555_vm2, %v602_v19, -inf }
 0x23b   : > { %604 = vmax.xlane.f32.xlu0 %v603_v22  ;;  %v2219_v23 = vpop.f32.mrb[7].mxu1 }
 0x251   : > { %901 = vrot.lane.b32.xlu0 %v2634_v9, %s2498_s17 }
 0x2c8   : > { %v605_v24 = vpop.xlane.xlu0 %604 }
 0x2c9   : > { %v606_v25 = vsub.f32 %v602_v19, %v605_v24 }
 0x2cb   : > { %v607_v26 = vmul.f32 1.442695, %v606_v25 }
 0x2cc   : > { %v902_v38 = vpop.permute.xlu0 %901 }
 0x2cd   : > { %2431 = vpow2.f32 %v607_v26  ;;  %v907_v40 = vsel %vm555_vm2, %v902_v38, 0 }
 0x2d7   : > { %v2432_v27 = vpop.eup %2431 }
 0x2d8   : > { %v609_v28 = vsel %vm555_vm2, %v2432_v27, 0.0 }
 0x2d9   : > { %610 = vadd.xlane.f32.xlu1 %v609_v28 }
 0x2ea   : > { %665 = vrot.lane.b32.xlu1 %v2634_v9, %s2499_s18 }
 0x2ee   : > { %784 = vrot.lane.b32.xlu1 %v2634_v9, %s2500_s19 }
 0x2f2   : > { %782 = vrot.lane.b32.xlu1 %v2634_v9, %s2501_s20 }
 0x2f6   : > { %899 = vrot.lane.b32.xlu1 %v2634_v9, %s2502_s21 }
 0x366   : > { %v611_v30 = vpop.xlane.xlu1 %610 }
 0x367   : > { %2433 = vrcp.f32 %v611_v30 }
 0x36a   : > { %v666_v34 = vpop.permute.xlu1 %665 }
 0x36e   : > { %v785_v36 = vpop.permute.xlu1 %784 }
 0x36f   : > { %v790_v37 = vsel %vm555_vm2, %v785_v36, 0 }
 0x371   : > { %v2434_v31 = vpop.eup %2433 }
 0x372   : > { %v613_v32 = vmul.f32 %v2434_v31, %v2432_v27  ;;  %v783_v39 = vpop.permute.xlu1 %782 }
 0x374   : > { %v614_v33 = vpack.c.bf16 %v613_v32, %v613_v32 }
 0x376   : > { %2223 = vmatmul.mubr.msk.bf16.vlgmr.msra.gmra.mrb[8].mxu1 %vm555_vm2, %v614_v33  ;;  %v900_v41 = vpop.permute.xlu1 %899 }
 0x377   : > { %2227 = vmatpush3.bf16.xpose.msra.mxu1 %v673_v35  ;;  %2228 = vmatprep.mubr.msk.bf16.mxu1 %vm2494_vm0, %v2493_v1 }
 0x378   : > { %2238 = vmatprep.subr.bf16.mxu1 %v2493_v1 }
 0x37e   : > { %2229 = vmatmul.mubr.msk.bf16.vlgmr.msra.gmra.mrb[12].mxu1 %vm555_vm2, %v666_v34 }
 0x37f   : > { %2239 = vmatpush3.bf16.xpose.msra.mxu1 %v790_v37  ;;  %2240 = vmatprep.mubr.msk.bf16.mxu1 %vm2494_vm0, %v2493_v1 }
 0x380   : > { %2250 = vmatprep.subr.bf16.mxu1 %v2493_v1 }
 0x386   : > { %2241 = vmatmul.mubr.msk.bf16.vlgmr.msra.gmra.mrb[16].mxu1 %vm555_vm2, %v783_v39  ;;  %v2413_v39 = vld [vmem:[%s2949_s4] sm:$0xff]  }
 0x387   : > { %2251 = vmatpush3.bf16.xpose.msra.mxu1 %v907_v40  ;;  %2252 = vmatprep.mubr.msk.bf16.mxu1 %vm2494_vm0, %v2493_v1  ;;  %v2414_v40 = vld [vmem:[%s2949_s4 + $0x8] sm:$0xff]  }
 0x388   : > { %2262 = vmatprep.subr.bf16.mxu1 %v2493_v1 }
 0x38e   : > { %2253 = vmatmul.mubr.msk.bf16.vlgmr.msra.gmra.mrb[20].mxu1 %vm555_vm2, %v900_v41 }
 0x38f   : > { %2266 = vmatprep.mubr.msk.bf16.mxu1 %vm2494_vm0, %v2493_v1  ;;  %2263 = vmatpush3.bf16.msra.mxu1 %v2413_v39 }
 0x390   : > { %2264 = vmatprep.subr.bf16.mxu1 %v2493_v1 }
 0x393   : > { %2265 = vmatpush3.bf16.msra.mxu1 %v2414_v40 }
 0x394   : > { %2278 = vmatprep.subr.bf16.mxu1 %v2493_v1 }
 0x449   : > { %v658_v42 = vpop.f32.mrb[8].mxu1 }
 0x44a   : > { %664 = vst.msk [vmem:[#allocation2] sm:$0xff] %vm555_vm2, %v658_v42  ;;  %v2224_v43 = vpop.f32.mrb[9].mxu1 }
 0x44b   : > { %v661_v44 = vpop.f32.mrb[10].mxu1 }
 0x44c   : > { %v2225_v45 = vpop.f32.mrb[11].mxu1 }
 0x451   : > { %v709_v46 = vpop.f32.mrb[12].mxu1 }
 0x452   : > { %v715_v47 = vsel %vm483_vm4, %v709_v46, -1e+30  ;;  %v2230_v48 = vpop.f32.mrb[13].mxu1 }
 0x453   : > { %v712_v49 = vpop.f32.mrb[14].mxu1  ;;  %v716_v50 = vsel %vm555_vm2, %v715_v47, -inf }
 0x454   : > { %717 = vmax.xlane.f32.xlu1 %v716_v50  ;;  %v2231_v51 = vpop.f32.mrb[15].mxu1 }
 0x459   : > { %v826_v52 = vpop.f32.mrb[16].mxu1 }
 0x45a   : > { %v832_v53 = vsel %vm483_vm4, %v826_v52, -1e+30  ;;  %v2242_v54 = vpop.f32.mrb[17].mxu1 }
 0x45b   : > { %v829_v55 = vpop.f32.mrb[18].mxu1  ;;  %v833_v56 = vsel %vm555_vm2, %v832_v53, -inf  ;;  %v2100_v54 = vld [vmem:[%s2957_s12] ss:$0 sm:$0xff] }
 0x45c   : > { %834 = vmax.xlane.f32.xlu0 %v833_v56  ;;  %v2243_v57 = vpop.f32.mrb[19].mxu1  ;;  %v478_v55 = vunpack.c.l.bf16 %v2625_v3 }
 0x461   : > { %v943_v58 = vpop.f32.mrb[20].mxu1 }
 0x462   : > { %v949_v59 = vsel %vm483_vm4, %v943_v58, -1e+30  ;;  %v2254_v60 = vpop.f32.mrb[21].mxu1 }
 0x463   : > { %v946_v61 = vpop.f32.mrb[22].mxu1  ;;  %v950_v62 = vsel %vm555_vm2, %v949_v59, -inf }
 0x464   : > { %951 = vmax.xlane.f32.xlu1 %v950_v62  ;;  %v2255_v63 = vpop.f32.mrb[23].mxu1 }
 0x465   : > { %v2415_v63 = vld [vmem:[%s2951_s6] sm:$0xff]  }
 0x4e1   : > { %v718_v0 = vpop.xlane.xlu1 %717 }
 0x4e2   : > { %v719_v2 = vsub.f32 %v715_v47, %v718_v0 }
 0x4e4   : > { %v720_v4 = vmul.f32 1.442695, %v719_v2 }
 0x4e6   : > { %2435 = vpow2.f32 %v720_v4 }
 0x4e9   : > { %v835_v13 = vpop.xlane.xlu0 %834 }
 0x4ea   : > { %v836_v14 = vsub.f32 %v832_v53, %v835_v13 }
 0x4ec   : > { %v837_v15 = vmul.f32 1.442695, %v836_v14 }
 0x4f0   : > { %v2436_v5 = vpop.eup %2435 }
 0x4f1   : > { %v952_v6 = vpop.xlane.xlu1 %951  ;;  %v722_v7 = vsel %vm555_vm2, %v2436_v5, 0.0 }
 0x4f2   : > { %v953_v8 = vsub.f32 %v949_v59, %v952_v6  ;;  %723 = vadd.xlane.f32.xlu1 %v722_v7  ;;  %v2416_v6 = vld [vmem:[%s2951_s6 + $0x8] sm:$0xff]   ;;  %v2412_v7 = vld [vmem:[%s2622_s23] sm:$0xff]  }
 0x4f4   : > { %v954_v10 = vmul.f32 1.442695, %v953_v8  ;;  %v2417_v8 = vld [vmem:[%s2950_s5] sm:$0xff]  }
 0x4f6   : > { %2437 = vpow2.f32 %v954_v10  ;;  %v2418_v10 = vld [vmem:[%s2950_s5 + $0x8] sm:$0xff]  }
 0x4f7   : > { %2439 = vpow2.f32 %v837_v15  ;;  %v2104_v15 = vld [vmem:[%s2957_s12 + $0x1] ss:$0 sm:$0xff] }
 0x500   : > { %v2438_v11 = vpop.eup %2437 }
 0x501   : > { %v956_v12 = vsel %vm555_vm2, %v2438_v11, 0.0  ;;  %v2440_v16 = vpop.eup %2439 }
 0x502   : > { %957 = vadd.xlane.f32.xlu0 %v956_v12  ;;  %v839_v17 = vsel %vm555_vm2, %v2440_v16, 0.0 }
 0x503   : > { %728 = vrot.lane.b32.xlu1 %v2634_v9, %s2503_s22  ;;  %s2961_s22 = smov 24  }
 0x518   : > { %845 = vrot.lane.b32.xlu0 %v2634_v9, %s2504_s24  ;;  %s2967_s24 = smov 24  }
 0x527   : > { %840 = vadd.xlane.f32.xlu1 %v839_v17  ;;  %v2105_v17 = vld [vmem:[%s2957_s12 + $0x2] ss:$0 sm:$0xff] }
 0x538   : > { %962 = vrot.lane.b32.xlu1 %v2634_v9, %s2505_s29 }
 0x57f   : > { %v724_v18 = vpop.xlane.xlu1 %723 }
 0x580   : > { %2441 = vrcp.f32 %v724_v18 }
 0x583   : > { %v729_v19 = vpop.permute.xlu1 %728 }
 0x584   : > { %v734_v20 = vsel %vm620_vm3, %v729_v19, 0 }
 0x585   : > { %2233 = vmatpush3.bf16.msra.mxu0 %v734_v20 }
 0x586   : > { %2244 = vmatprep.subr.bf16.mxu0 %v2493_v1 }
 0x58a   : > { %v2442_v21 = vpop.eup %2441 }
 0x58b   : > { %v726_v22 = vmul.f32 %v2442_v21, %v2436_v5  ;;  %v2110_v21 = vld [vmem:[%s2952_s7] ss:$0 sm:$0xff] }
 0x58d   : > { %v727_v23 = vpack.c.bf16 %v726_v22, %v726_v22 }
 0x58f   : > { %v958_v24 = vpop.xlane.xlu0 %957  ;;  %2235 = vmatmul.mubr.msk.bf16.vlgmr.msra.gmra.mrb[0].mxu0 %vm555_vm2, %v727_v23 }
 0x590   : > { %2246 = vmatprep.mubr.msk.bf16.mxu0 %vm2494_vm0, %v2493_v1 }
 0x593   : > { %v846_v25 = vpop.permute.xlu0 %845 }
 0x594   : > { %v851_v9 = vsel %vm620_vm3, %v846_v25, 0 }
 0x595   : > { %2245 = vmatpush3.bf16.msra.mxu0 %v851_v9 }
 0x596   : > { %2256 = vmatprep.subr.bf16.mxu0 %v2493_v1 }
 0x5b4   : > { %v841_v26 = vpop.xlane.xlu1 %840 }
 0x5b5   : > { %2443 = vrcp.f32 %v841_v26 }
 0x5b6   : > { %2445 = vrcp.f32 %v958_v24 }
 0x5b8   : > { %v963_v29 = vpop.permute.xlu1 %962 }
 0x5b9   : > { %v968_v32 = vsel %vm620_vm3, %v963_v29, 0  ;;  %v2106_v29 = vld [vmem:[%s2957_s12 + $0x3] ss:$0 sm:$0xff] }
 0x5bf   : > { %v2444_v27 = vpop.eup %2443 }
 0x5c0   : > { %v843_v28 = vmul.f32 %v2444_v27, %v2440_v16  ;;  %v2446_v31 = vpop.eup %2445 }
 0x5c1   : > { %v960_v33 = vmul.f32 %v2446_v31, %v2438_v11 }
 0x5c2   : > { %v844_v30 = vpack.c.bf16 %v843_v28, %v843_v28 }
 0x5c3   : > { %v961_v34 = vpack.c.bf16 %v960_v33, %v960_v33 }
 0x5c4   : > { %2247 = vmatmul.mubr.msk.bf16.vlgmr.msra.gmra.mrb[4].mxu0 %vm555_vm2, %v844_v30 }
 0x5c5   : > { %2257 = vmatpush3.bf16.msra.mxu0 %v968_v32  ;;  %2258 = vmatprep.mubr.msk.bf16.mxu0 %vm2494_vm0, %v2493_v1 }
 0x5c6   : > { %2270 = vmatprep.subr.bf16.mxu0 %v2493_v1 }
 0x5cc   : > { %2259 = vmatmul.mubr.msk.bf16.vlgmr.msra.gmra.mrb[8].mxu0 %vm555_vm2, %v961_v34 }
 0x5cd   : > { %2274 = vmatprep.mubr.msk.bf16.mxu0 %vm2494_vm0, %v2493_v1  ;;  %2271 = vmatpush3.bf16.msra.mxu0 %v2417_v8 }
 0x5ce   : > { %2272 = vmatprep.subr.bf16.mxu0 %v2493_v1 }
 0x5d1   : > { %2273 = vmatpush3.bf16.msra.mxu0 %v2418_v10 }
 0x5d2   : > { %2286 = vmatprep.subr.bf16.mxu0 %v2493_v1 }
 0x662   : > { %v770_v35 = vpop.f32.mrb[0].mxu0 }
 0x663   : > { %777 = vrot.lane.b32.xlu1 %v770_v35, %s2963_s30  ;;  %v2236_v36 = vpop.f32.mrb[1].mxu0 }
 0x664   : > { %v773_v37 = vpop.f32.mrb[2].mxu0 }
 0x665   : > { %v2237_v38 = vpop.f32.mrb[3].mxu0 }
 0x697   : > { %v887_v41 = vpop.f32.mrb[4].mxu0 }
 0x698   : > { %894 = vrot.lane.b32.xlu0 %v887_v41, %s2962_s15  ;;  %v2248_v42 = vpop.f32.mrb[5].mxu0 }
 0x699   : > { %v890_v43 = vpop.f32.mrb[6].mxu0 }
 0x69a   : > { %v2249_v44 = vpop.f32.mrb[7].mxu0 }
 0x69f   : > { %v1004_v45 = vpop.f32.mrb[8].mxu0 }
 0x6a0   : > { %1011 = vrot.lane.b32.xlu1 %v1004_v45, %s2961_s22  ;;  %v2260_v46 = vpop.f32.mrb[9].mxu0 }
 0x6a1   : > { %v1007_v47 = vpop.f32.mrb[10].mxu0 }
 0x6a2   : > { %v2261_v48 = vpop.f32.mrb[11].mxu0 }
 0x6d5   : > { %v778_v49 = vpop.permute.xlu1 %777 }
 0x6d6   : > { %781 = vst.msk [vmem:[#allocation2] sm:$0xff] %vm780_vm5, %v778_v49 }
 0x70a   : > { %v895_v50 = vpop.permute.xlu0 %894 }
 0x70b   : > { %898 = vst.msk [vmem:[#allocation2] sm:$0xff] %vm897_vm6, %v895_v50 }
 0x712   : > { %v1012_v51 = vpop.permute.xlu1 %1011 }
 0x713   : > { %1015 = vst.msk [vmem:[#allocation2] sm:$0xff] %vm1014_vm7, %v1012_v51 }
 0x71a   : > { %v1016_v52 = vld [vmem:[#allocation2] sm:$0xff] }
 0x71b   : > { %v1017_v53 = vpack.c.bf16 %v1016_v52, %v1016_v52 }
 0x71d   : > { %2267 = vmatmul.mubr.msk.bf16.vlgmr.msra.gmra.mrb[24].mxu1 %vm507_vm1, %v1017_v53 }
 0x71e   : > { %2282 = vmatprep.mubr.msk.bf16.mxu1 %vm2494_vm0, %v2493_v1  ;;  %2279 = vmatpush3.bf16.msra.mxu1 %v2415_v63 }
 0x71f   : > { %2280 = vmatprep.subr.bf16.mxu1 %v2493_v1 }
 0x722   : > { %2281 = vmatpush3.bf16.msra.mxu1 %v2416_v6 }
 0x723   : > { %2292 = vmatprep.subr.bf16.mxu1 %v2493_v1 }
 0x725   : > { %2283 = vmatmul.mubr.msk.bf16.vlgmr.msra.gmra.mrb[28].mxu1 %vm507_vm1, %v2412_v7 }
 0x726   : > { %2294 = vmatprep.mubr.msk.bf16.mxu1 %vm2494_vm0, %v2493_v1 }
 0x7f0   : > { %v1076_v56 = vpop.f32.mrb[24].mxu1 }
 0x7f1   : > { %v1077_v57 = vadd.f32 %v2100_v54, %v1076_v56  ;;  %v2268_v58 = vpop.f32.mrb[25].mxu1 }
 0x7f2   : > { %v1079_v59 = vpop.f32.mrb[26].mxu1 }
 0x7f3   : > { %v2269_v60 = vpop.f32.mrb[27].mxu1  ;;  %v1084_v61 = vadd.f32 %v1077_v57, %v478_v55 }
 0x7f5   : > { %v1085_v62 = vsel %vm507_vm1, %v1084_v61, 0.0 }
 0x7f6   : > { %1086 = vadd.xlane.f32.xlu0 %v1085_v62 }
 0x7f8   : > { %v1241_v22 = vpop.f32.mrb[28].mxu1 }
 0x7f9   : > { %v1242_v23 = vadd.f32 %v2110_v21, %v1241_v22  ;;  %v2284_v24 = vpop.f32.mrb[29].mxu1 }
 0x7fa   : > { %v1244_v25 = vpop.f32.mrb[30].mxu1 }
 0x7fb   : > { %v1245_v9 = vadd.f32 %v2110_v21, %v1244_v25  ;;  %v2285_v26 = vpop.f32.mrb[31].mxu1 }
 0x7fd   : > { %v2781_v27 = vpack.c.bf16 %v1245_v9, %v1242_v23 }
 0x7ff   : > { %v1254_v28 = vsel %vm555_vm2, %v2781_v27, 0 }
 0x80c   : > { %1360 = vrot.lane.b32.xlu0 %v2781_v27, %s2499_s18 }
 0x810   : > { %1473 = vrot.lane.b32.xlu0 %v2781_v27, %s2501_s20 }
 0x814   : > { %1586 = vrot.lane.b32.xlu0 %v2781_v27, %s2502_s21 }
 0x883   : > { %v1087_v0 = vpop.xlane.xlu0 %1086 }
 0x884   : > { %v1089_v2 = vmul.f32 0.03125, %v1087_v0 }
 0x886   : > { %v1090_v3 = vsub.f32 %v1084_v61, %v1089_v2 }
 0x887   : > { %v1361_v34 = vpop.permute.xlu0 %1360 }
 0x888   : > { %v1091_v4 = vmul.f32 %v1090_v3, %v1090_v3  ;;  %v1366_v37 = vsel %vm555_vm2, %v1361_v34, 0 }
 0x88a   : > { %v1092_v5 = vsel %vm507_vm1, %v1091_v4, 0.0 }
 0x88b   : > { %1093 = vadd.xlane.f32.xlu1 %v1092_v5  ;;  %v1474_v38 = vpop.permute.xlu0 %1473 }
 0x88c   : > { %v1479_v40 = vsel %vm555_vm2, %v1474_v38, 0 }
 0x88f   : > { %v1587_v41 = vpop.permute.xlu0 %1586 }
 0x890   : > { %v1592_v43 = vsel %vm555_vm2, %v1587_v41, 0 }
 0x918   : > { %v1094_v11 = vpop.xlane.xlu1 %1093 }
 0x919   : > { %v1095_v12 = vmul.f32 0.03125, %v1094_v11 }
 0x91b   : > { %v1096_v13 = vadd.f32 1e-05, %v1095_v12 }
 0x91d   : > { %2447 = vrsqrt.f32 %v1096_v13 }
 0x927   : > { %v2448_v14 = vpop.eup %2447 }
 0x928   : > { %v1098_v16 = vmul.f32 %v2448_v14, %v1090_v3 }
 0x92a   : > { %v1103_v18 = vmul.f32 %v2104_v15, %v1098_v16 }
 0x92c   : > { %v2771_v19 = vadd.f32 %v2105_v17, %v1103_v18 }
 0x92e   : > { %v1109_v20 = vpack.c.bf16 %v2771_v19, %v2771_v19 }
 0x930   : > { %2275 = vmatmul.mubr.msk.bf16.vlgmr.msra.gmra.mrb[12].mxu0 %vm507_vm1, %v1109_v20 }
 0x931   : > { %2288 = vmatprep.mubr.msk.bf16.mxu0 %vm2494_vm0, %v2493_v1  ;;  %2287 = vmatpush3.bf16.xpose.msra.mxu0 %v1254_v28 }
 0x932   : > { %2298 = vmatprep.subr.bf16.mxu0 %v2493_v1 }
 0xa03   : > { %v1168_v30 = vpop.f32.mrb[12].mxu0 }
 0xa04   : > { %v1169_v31 = vadd.f32 %v2106_v29, %v1168_v30  ;;  %v2276_v32 = vpop.f32.mrb[13].mxu0 }
 0xa05   : > { %v1171_v33 = vpop.f32.mrb[14].mxu0 }
 0xa06   : > { %v1248_v35 = vpack.c.bf16 %v1169_v31, %v1169_v31  ;;  %v2277_v36 = vpop.f32.mrb[15].mxu0 }
 0xa08   : > { %1358 = vrot.lane.b32.xlu1 %v1248_v35, %s2499_s18  ;;  %2289 = vmatmul.mubr.msk.bf16.vlgmr.msra.gmra.mrb[16].mxu0 %vm555_vm2, %v1248_v35 }
 0xa09   : > { %2299 = vmatpush3.bf16.xpose.msra.mxu0 %v1366_v37  ;;  %2300 = vmatprep.mubr.msk.bf16.mxu0 %vm2494_vm0, %v2493_v1 }
 0xa0a   : > { %2310 = vmatprep.subr.bf16.mxu0 %v2493_v1 }
 0xa0c   : > { %1471 = vrot.lane.b32.xlu1 %v1248_v35, %s2501_s20 }
 0xa10   : > { %1584 = vrot.lane.b32.xlu1 %v1248_v35, %s2502_s21 }
 0xa7a   : > { %v1359_v39 = vpop.permute.xlu1 %1358 }
 0xa7b   : > { %2301 = vmatmul.mubr.msk.bf16.vlgmr.msra.gmra.mrb[20].mxu0 %vm555_vm2, %v1359_v39 }
 0xa7c   : > { %2311 = vmatpush3.bf16.xpose.msra.mxu0 %v1479_v40  ;;  %2312 = vmatprep.mubr.msk.bf16.mxu0 %vm2494_vm0, %v2493_v1 }
 0xa7d   : > { %2322 = vmatprep.subr.bf16.mxu0 %v2493_v1 }
 0xa7e   : > { %v1472_v42 = vpop.permute.xlu1 %1471 }
 0xa82   : > { %v1585_v44 = vpop.permute.xlu1 %1584 }
 0xa83   : > { %2313 = vmatmul.mubr.msk.bf16.vlgmr.msra.gmra.mrb[24].mxu0 %vm555_vm2, %v1472_v42 }
 0xa84   : > { %2323 = vmatpush3.bf16.xpose.msra.mxu0 %v1592_v43  ;;  %2324 = vmatprep.mubr.msk.bf16.mxu0 %vm2494_vm0, %v2493_v1 }
 0xa85   : > { %2334 = vmatprep.subr.bf16.mxu0 %v2493_v1 }
 0xa8b   : > { %2325 = vmatmul.mubr.msk.bf16.vlgmr.msra.gmra.mrb[28].mxu0 %vm555_vm2, %v1585_v44 }
 0xa8c   : > { %2338 = vmatprep.mubr.msk.bf16.mxu0 %vm2494_vm0, %v2493_v1 }
 0xadb   : > { %v1290_v45 = vpop.f32.mrb[16].mxu0 }
 0xadc   : > { %v2290_v46 = vpop.f32.mrb[17].mxu0  ;;  %v1297_v47 = vsel %vm1296_vm8, %v1290_v45, -inf }
 0xadd   : > { %1298 = vmax.xlane.f32.xlu0 %v1297_v47  ;;  %v1293_v48 = vpop.f32.mrb[18].mxu0 }
 0xade   : > { %v2291_v49 = vpop.f32.mrb[19].mxu0 }
 0xb4e   : > { %v1402_v50 = vpop.f32.mrb[20].mxu0 }
 0xb4f   : > { %v2302_v51 = vpop.f32.mrb[21].mxu0  ;;  %v1408_v52 = vsel %vm1296_vm8, %v1402_v50, -inf }
 0xb50   : > { %1409 = vmax.xlane.f32.xlu1 %v1408_v52  ;;  %v1405_v53 = vpop.f32.mrb[22].mxu0  ;;  %v2419_v51 = vld [vmem:[%s2953_s8] sm:$0xff]   ;;  %v2420_v52 = vld [vmem:[%s2953_s8 + $0x8] sm:$0xff]  }
 0xb51   : > { %v2303_v54 = vpop.f32.mrb[23].mxu0  ;;  %2335 = vmatpush3.bf16.msra.mxu0 %v2419_v51 }
 0xb52   : > { %2336 = vmatprep.subr.bf16.mxu0 %v2493_v1 }
 0xb55   : > { %2337 = vmatpush3.bf16.msra.mxu0 %v2420_v52 }
 0xb56   : > { %v1515_v55 = vpop.f32.mrb[24].mxu0  ;;  %2350 = vmatprep.subr.bf16.mxu0 %v2493_v1 }
 0xb57   : > { %v2314_v56 = vpop.f32.mrb[25].mxu0  ;;  %v1521_v57 = vsel %vm1296_vm8, %v1515_v55, -inf }
 0xb58   : > { %1522 = vmax.xlane.f32.xlu0 %v1521_v57  ;;  %v1518_v58 = vpop.f32.mrb[26].mxu0 }
 0xb59   : > { %v2315_v59 = vpop.f32.mrb[27].mxu0 }
 0xb5e   : > { %v1628_v60 = vpop.f32.mrb[28].mxu0 }
 0xb5f   : > { %v2326_v61 = vpop.f32.mrb[29].mxu0  ;;  %v1634_v62 = vsel %vm1296_vm8, %v1628_v60, -inf }
 0xb60   : > { %1635 = vmax.xlane.f32.xlu0 %v1634_v62  ;;  %v1631_v63 = vpop.f32.mrb[30].mxu0 }
 0xb61   : > { %v2327_v0 = vpop.f32.mrb[31].mxu0 }
 0xb6a   : > { %v1299_v2 = vpop.xlane.xlu0 %1298 }
 0xb6b   : > { %v1300_v3 = vsub.f32 %v1290_v45, %v1299_v2 }
 0xb6d   : > { %v1301_v4 = vmul.f32 1.442695, %v1300_v3  ;;  %v2123_v3 = vld [vmem:[%s2957_s12 + $0x4] ss:$0 sm:$0xff] }
 0xb6f   : > { %2449 = vpow2.f32 %v1301_v4 }
 0xb79   : > { %v2450_v5 = vpop.eup %2449 }
 0xb7a   : > { %v1303_v6 = vsel %vm1296_vm8, %v2450_v5, 0.0 }
 0xb7b   : > { %1304 = vadd.xlane.f32.xlu1 %v1303_v6 }
 0xb8c   : > { %1310 = vrot.lane.b32.xlu1 %v2781_v27, %s2496_s14  ;;  %s2964_s14 = smov 88  }
 0xbdd   : > { %v1410_v7 = vpop.xlane.xlu1 %1409 }
 0xbde   : > { %v1411_v8 = vsub.f32 %v1402_v50, %v1410_v7 }
 0xbe0   : > { %v1412_v10 = vmul.f32 1.442695, %v1411_v8 }
 0xbe2   : > { %2451 = vpow2.f32 %v1412_v10 }
 0xbe5   : > { %v1523_v11 = vpop.xlane.xlu0 %1522 }
 0xbe6   : > { %v1524_v12 = vsub.f32 %v1515_v55, %v1523_v11 }
 0xbe8   : > { %v1525_v13 = vmul.f32 1.442695, %v1524_v12 }
 0xbea   : > { %2453 = vpow2.f32 %v1525_v13 }
 0xbec   : > { %v2452_v14 = vpop.eup %2451 }
 0xbed   : > { %v1636_v15 = vpop.xlane.xlu0 %1635  ;;  %v1414_v16 = vsel %vm1296_vm8, %v2452_v14, 0.0 }
 0xbee   : > { %v1637_v17 = vsub.f32 %v1628_v60, %v1636_v15  ;;  %1415 = vadd.xlane.f32.xlu0 %v1414_v16 }
 0xbf0   : > { %v1638_v18 = vmul.f32 1.442695, %v1637_v17  ;;  %v2421_v17 = vld [vmem:[%s2954_s9] sm:$0xff]  }
 0xbf2   : > { %2455 = vpow2.f32 %v1638_v18  ;;  %v2422_v18 = vld [vmem:[%s2954_s9 + $0x8] sm:$0xff]  }
 0xbf4   : > { %v2454_v20 = vpop.eup %2453 }
 0xbf5   : > { %v1527_v21 = vsel %vm1296_vm8, %v2454_v20, 0.0 }
 0xbf6   : > { %1528 = vadd.xlane.f32.xlu1 %v1527_v21  ;;  %v2425_v21 = vld [vmem:[%s2956_s11 + $0x10] sm:$0xff]  }
 0xbfc   : > { %v2456_v22 = vpop.eup %2455 }
 0xbfd   : > { %v1640_v23 = vsel %vm1296_vm8, %v2456_v22, 0.0 }
 0xbfe   : > { %1641 = vadd.xlane.f32.xlu0 %v1640_v23  ;;  %v2427_v23 = vld [vmem:[%s2956_s11 + $0x20] sm:$0xff]  }
 0xc07   : > { %1533 = vrot.lane.b32.xlu1 %v2781_v27, %s2500_s19  ;;  %s2968_s19 = sshll.u32 %s2974_s25, 2 }
 0xc08   : > { %v1305_v24 = vpop.xlane.xlu1 %1304 }
 0xc09   : > { %2457 = vrcp.f32 %v1305_v24  ;;  %v2428_v24 = vld [vmem:[%s2956_s11 + $0x28] sm:$0xff]  }
 0xc0b   : > { %1646 = vrot.lane.b32.xlu1 %v2781_v27, %s2498_s17  ;;  %s2965_s17 = smov 8  }
 0xc0c   : > { %v1311_v25 = vpop.permute.xlu1 %1310 }
 0xc0d   : > { %2293 = vmatpush3.bf16.msra.mxu1 %v1311_v25 }
 0xc0e   : > { %2304 = vmatprep.subr.bf16.mxu1 %v2493_v1 }
 0xc13   : > { %v2458_v9 = vpop.eup %2457 }
 0xc14   : > { %v1307_v26 = vmul.f32 %v2458_v9, %v2450_v5  ;;  %1420 = vrot.lane.b32.xlu0 %v2781_v27, %s2964_s14 }
 0xc16   : > { %v1308_v28 = vpack.c.bf16 %v1307_v26, %v1307_v26 }
 0xc18   : > { %2295 = vmatmul.mubr.msk.bf16.vlgmr.msra.gmra.mrb[32].mxu1 %vm1296_vm8, %v1308_v28 }
 0xc19   : > { %2306 = vmatprep.mubr.msk.bf16.mxu1 %vm2494_vm0, %v2493_v1 }
 0xc7b   : > { %v1416_v29 = vpop.xlane.xlu0 %1415 }
 0xc7c   : > { %2459 = vrcp.f32 %v1416_v29  ;;  %v2127_v29 = vld [vmem:[%s2957_s12 + $0x5] ss:$0 sm:$0xff] }
 0xc83   : > { %v1529_v30 = vpop.xlane.xlu1 %1528 }
 0xc84   : > { %2461 = vrcp.f32 %v1529_v30 }
 0xc86   : > { %v2460_v31 = vpop.eup %2459 }
 0xc87   : > { %v1418_v33 = vmul.f32 %v2460_v31, %v2452_v14  ;;  %v1534_v36 = vpop.permute.xlu1 %1533  ;;  %v2128_v31 = vld [vmem:[%s2957_s12 + $0x6] ss:$0 sm:$0xff] }
 0xc89   : > { %v1419_v35 = vpack.c.bf16 %v1418_v33, %v1418_v33 }
 0xc8b   : > { %v1642_v32 = vpop.xlane.xlu0 %1641  ;;  %v1647_v40 = vpop.permute.xlu1 %1646 }
 0xc8c   : > { %2463 = vrcp.f32 %v1642_v32 }
 0xc8e   : > { %v2462_v27 = vpop.eup %2461 }
 0xc8f   : > { %v1421_v34 = vpop.permute.xlu0 %1420  ;;  %v1531_v37 = vmul.f32 %v2462_v27, %v2454_v20  ;;  %v2424_v20 = vld [vmem:[%s2956_s11 + $0x8] sm:$0xff]   ;;  %v2430_v27 = vld [vmem:[%s2956_s11 + $0x38] sm:$0xff]  }
 0xc90   : > { %2305 = vmatpush3.bf16.msra.mxu1 %v1421_v34 }
 0xc91   : > { %2316 = vmatprep.subr.bf16.mxu1 %v2493_v1  ;;  %v1532_v38 = vpack.c.bf16 %v1531_v37, %v1531_v37 }
 0xc93   : > { %2307 = vmatmul.mubr.msk.bf16.vlgmr.msra.gmra.mrb[36].mxu1 %vm1296_vm8, %v1419_v35  ;;  %v2429_v35 = vld [vmem:[%s2956_s11 + $0x30] sm:$0xff]  }
 0xc94   : > { %2317 = vmatpush3.bf16.msra.mxu1 %v1534_v36  ;;  %2318 = vmatprep.mubr.msk.bf16.mxu1 %vm2494_vm0, %v2493_v1  ;;  %v2129_v36 = vld [vmem:[%s2955_s10] ss:$0 sm:$0xff] }
 0xc95   : > { %2328 = vmatprep.subr.bf16.mxu1 %v2493_v1 }
 0xc96   : > { %v2464_v39 = vpop.eup %2463 }
 0xc97   : > { %v1644_v41 = vmul.f32 %v2464_v39, %v2456_v22  ;;  %v2426_v22 = vld [vmem:[%s2956_s11 + $0x18] sm:$0xff]  }
 0xc99   : > { %v1645_v42 = vpack.c.bf16 %v1644_v41, %v1644_v41 }
 0xc9b   : > { %2319 = vmatmul.mubr.msk.bf16.vlgmr.msra.gmra.mrb[40].mxu1 %vm1296_vm8, %v1532_v38 }
 0xc9c   : > { %2329 = vmatpush3.bf16.msra.mxu1 %v1647_v40  ;;  %2330 = vmatprep.mubr.msk.bf16.mxu1 %vm2494_vm0, %v2493_v1 }
 0xc9d   : > { %2342 = vmatprep.subr.bf16.mxu1 %v2493_v1 }
 0xca3   : > { %2331 = vmatmul.mubr.msk.bf16.vlgmr.msra.gmra.mrb[44].mxu1 %vm1296_vm8, %v1645_v42 }
 0xca4   : > { %2346 = vmatprep.mubr.msk.bf16.mxu1 %vm2494_vm0, %v2493_v1  ;;  %2343 = vmatpush3.bf16.msra.mxu1 %v2421_v17 }
 0xca5   : > { %2344 = vmatprep.subr.bf16.mxu1 %v2493_v1 }
 0xca8   : > { %2345 = vmatpush3.bf16.msra.mxu1 %v2422_v18 }
 0xceb   : > { %v1350_v43 = vpop.f32.mrb[32].mxu1 }
 0xcec   : > { %1356 = vst.msk [vmem:[#allocation2] sm:$0xff] %vm555_vm2, %v1350_v43  ;;  %v2296_v44 = vpop.f32.mrb[33].mxu1 }
 0xced   : > { %v1353_v45 = vpop.f32.mrb[34].mxu1 }
 0xcee   : > { %v2297_v46 = vpop.f32.mrb[35].mxu1 }
 0xd66   : > { %v1460_v47 = vpop.f32.mrb[36].mxu1 }
 0xd67   : > { %1467 = vrot.lane.b32.xlu0 %v1460_v47, %s2965_s17  ;;  %v2308_v48 = vpop.f32.mrb[37].mxu1 }
 0xd68   : > { %v1463_v49 = vpop.f32.mrb[38].mxu1 }
 0xd69   : > { %v2309_v50 = vpop.f32.mrb[39].mxu1 }
 0xd6e   : > { %v1573_v53 = vpop.f32.mrb[40].mxu1 }
 0xd6f   : > { %1580 = vrot.lane.b32.xlu1 %v1573_v53, %s2966_s16  ;;  %v2320_v54 = vpop.f32.mrb[41].mxu1  ;;  %s475_s16 = scalar_lea.vmem %s2958_s13, %s2968_s19 }
 0xd70   : > { %v1576_v55 = vpop.f32.mrb[42].mxu1 }
 0xd71   : > { %v2321_v56 = vpop.f32.mrb[43].mxu1 }
 0xd76   : > { %v1686_v57 = vpop.f32.mrb[44].mxu1 }
 0xd77   : > { %1693 = vrot.lane.b32.xlu0 %v1686_v57, %s2967_s24  ;;  %v2332_v58 = vpop.f32.mrb[45].mxu1 }
 0xd78   : > { %v1689_v59 = vpop.f32.mrb[46].mxu1 }
 0xd79   : > { %v2333_v60 = vpop.f32.mrb[47].mxu1 }
 0xd7a   : > { %v2142_v60 = vld [vmem:[%s2957_s12 + $0x8] ss:$0 sm:$0xff] }
 0xdd9   : > { %v1468_v61 = vpop.permute.xlu0 %1467 }
 0xdda   : > { %1470 = vst.msk [vmem:[#allocation2] sm:$0xff] %vm780_vm5, %v1468_v61 }
 0xde1   : > { %v1581_v62 = vpop.permute.xlu1 %1580 }
 0xde2   : > { %1583 = vst.msk [vmem:[#allocation2] sm:$0xff] %vm897_vm6, %v1581_v62  ;;  %v2143_v62 = vld [vmem:[%s2957_s12 + $0x9] ss:$0 sm:$0xff] }
 0xde9   : > { %v1694_v63 = vpop.permute.xlu0 %1693 }
 0xdea   : > { %1696 = vst.msk [vmem:[#allocation2] sm:$0xff] %vm1014_vm7, %v1694_v63 }
 0xdf1   : > { %v1697_v0 = vld [vmem:[#allocation2] sm:$0xff] }
 0xdf2   : > { %v1698_v2 = vpack.c.bf16 %v1697_v0, %v1697_v0 }
 0xdf4   : > { %2339 = vmatmul.mubr.msk.bf16.vlgmr.msra.gmra.mrb[32].mxu0 %vm507_vm1, %v1698_v2 }
 0xdf5   : > { %2366 = vmatprep.mubr.msk.bf16.mxu0 %vm2494_vm0, %v2493_v1 }
 0xec7   : > { %v1757_v4 = vpop.f32.mrb[32].mxu0 }
 0xec8   : > { %v1758_v5 = vadd.f32 %v2123_v3, %v1757_v4  ;;  %v2340_v6 = vpop.f32.mrb[33].mxu0 }
 0xec9   : > { %v1760_v7 = vpop.f32.mrb[34].mxu0 }
 0xeca   : > { %v2341_v8 = vpop.f32.mrb[35].mxu0  ;;  %v1765_v10 = vadd.f32 %v1758_v5, %v2771_v19  ;;  %v2423_v19 = vld [vmem:[%s2956_s11] sm:$0xff]  }
 0xecb   : > { %2351 = vmatpush3.bf16.msra.mxu0 %v2423_v19 }
 0xecc   : > { %v1766_v11 = vsel %vm507_vm1, %v1765_v10, 0.0  ;;  %2352 = vmatprep.subr.bf16.mxu0 %v2493_v1 }
 0xecd   : > { %1767 = vadd.xlane.f32.xlu1 %v1766_v11 }
 0xecf   : > { %2353 = vmatpush3.bf16.msra.mxu0 %v2424_v20 }
 0xed0   : > { %2354 = vmatprep.subr.bf16.mxu0 %v2493_v1 }
 0xed3   : > { %2355 = vmatpush3.bf16.msra.mxu0 %v2425_v21 }
 0xed4   : > { %2356 = vmatprep.subr.bf16.mxu0 %v2493_v1 }
 0xed7   : > { %2357 = vmatpush3.bf16.msra.mxu0 %v2426_v22 }
 0xed8   : > { %2358 = vmatprep.subr.bf16.mxu0 %v2493_v1 }
 0xedb   : > { %2359 = vmatpush3.bf16.msra.mxu0 %v2427_v23 }
 0xedc   : > { %2360 = vmatprep.subr.bf16.mxu0 %v2493_v1 }
 0xedf   : > { %2361 = vmatpush3.bf16.msra.mxu0 %v2428_v24 }
 0xee0   : > { %2362 = vmatprep.subr.bf16.mxu0 %v2493_v1 }
 0xee3   : > { %2363 = vmatpush3.bf16.msra.mxu0 %v2429_v35 }
 0xee4   : > { %2364 = vmatprep.subr.bf16.mxu0 %v2493_v1  ;;  %v2133_v1 = vld [vmem:[%s2957_s12 + $0x7] ss:$0 sm:$0xff] }
 0xee7   : > { %2365 = vmatpush3.bf16.msra.mxu0 %v2430_v27 }
 0xf5a   : > { %v1768_v12 = vpop.xlane.xlu1 %1767 }
 0xf5b   : > { %v1769_v13 = vmul.f32 0.03125, %v1768_v12 }
 0xf5d   : > { %v1770_v14 = vsub.f32 %v1765_v10, %v1769_v13 }
 0xf5f   : > { %v1771_v15 = vmul.f32 %v1770_v14, %v1770_v14 }
 0xf61   : > { %v1772_v16 = vsel %vm507_vm1, %v1771_v15, 0.0 }
 0xf62   : > { %1773 = vadd.xlane.f32.xlu0 %v1772_v16 }
 0xfef   : > { %v1774_v25 = vpop.xlane.xlu0 %1773 }
 0xff0   : > { %v1775_v9 = vmul.f32 0.03125, %v1774_v25 }
 0xff2   : > { %v1776_v26 = vadd.f32 1e-05, %v1775_v9 }
 0xff4   : > { %2465 = vrsqrt.f32 %v1776_v26 }
 0xffe   : > { %v2466_v28 = vpop.eup %2465 }
 0xfff   : > { %v1778_v30 = vmul.f32 %v2466_v28, %v1770_v14 }
0x1001   : > { %v1783_v32 = vmul.f32 %v2127_v29, %v1778_v30 }
0x1003   : > { %v1788_v33 = vadd.f32 %v2128_v31, %v1783_v32 }
0x1005   : > { %v1789_v34 = vpack.c.bf16 %v1788_v33, %v1788_v33 }
0x1007   : > { %2347 = vmatmul.mubr.msk.bf16.vlgmr.msra.gmra.mrb[48].mxu1 %vm507_vm1, %v1789_v34 }
0x10da   : > { %v1850_v37 = vpop.f32.mrb[48].mxu1 }
0x10db   : > { %v1851_v38 = vadd.f32 %v2129_v36, %v1850_v37  ;;  %v2348_v39 = vpop.f32.mrb[49].mxu1 }
0x10dc   : > { %v1853_v40 = vpop.f32.mrb[50].mxu1 }
0x10dd   : > { %v1856_v41 = vmax.f32 %v1851_v38, 0.0  ;;  %v2349_v42 = vpop.f32.mrb[51].mxu1 }
0x10df   : > { %v1857_v43 = vpack.c.bf16 %v1856_v41, %v1856_v41 }
0x10e1   : > { %2367 = vmatmul.mubr.bf16.vlgmr.msra.gmra.mrb[36].mxu0 %v1857_v43 }
0x11b4   : > { %v1961_v44 = vpop.f32.mrb[36].mxu0 }
0x11b5   : > { %v1962_v45 = vadd.f32 %v2133_v1, %v1961_v44  ;;  %v2368_v46 = vpop.f32.mrb[37].mxu0 }
0x11b6   : > { %v1964_v47 = vpop.f32.mrb[38].mxu0 }
0x11b7   : > { %v2369_v48 = vpop.f32.mrb[39].mxu0  ;;  %v1969_v49 = vadd.f32 %v1962_v45, %v1788_v33 }
0x11b9   : > { %v1970_v50 = vsel %vm507_vm1, %v1969_v49, 0.0 }
0x11ba   : > { %1971 = vadd.xlane.f32.xlu0 %v1970_v50 }
0x1247   : > { %v1972_v51 = vpop.xlane.xlu0 %1971 }
0x1248   : > { %v1973_v52 = vmul.f32 0.03125, %v1972_v51 }
0x124a   : > { %v1974_v53 = vsub.f32 %v1969_v49, %v1973_v52 }
0x124c   : > { %v1975_v54 = vmul.f32 %v1974_v53, %v1974_v53 }
0x124e   : > { %v1976_v55 = vsel %vm507_vm1, %v1975_v54, 0.0 }
0x124f   : > { %1977 = vadd.xlane.f32.xlu1 %v1976_v55 }
0x12dc   : > { %v1978_v56 = vpop.xlane.xlu1 %1977 }
0x12dd   : > { %v1979_v57 = vmul.f32 0.03125, %v1978_v56 }
0x12df   : > { %v1980_v58 = vadd.f32 1e-05, %v1979_v57 }
0x12e1   : > { %2467 = vrsqrt.f32 %v1980_v58 }
0x12eb   : > { %v2468_v59 = vpop.eup %2467 }
0x12ec   : > { %v1982_v61 = vmul.f32 %v2468_v59, %v1974_v53 }
0x12ee   : > { %v1987_v63 = vmul.f32 %v2142_v60, %v1982_v61 }
0x12f0   : > { %v1992_v0 = vadd.f32 %v2143_v62, %v1987_v63 }
0x12f2   : > { %v1993_v2 = vpack.c.bf16 %v1992_v0, %v1992_v0 }
0x12f4   : > { %1995 = vst.msk [vmem:[%s475_s16] sm:$0xf] %vm1994_vm9, %v1993_v2 }
0x12f5 PF: > { %s23_s27 = sadd.s32 1, %s2491_s27   ;;  %s2969_s25 = smov %s2487_s26 }
0x12f6   : > { %p20_p5 = scmp.ge.s32.totalorder %s23_s27, 4   ;;  %s2970_s26 = smov %s2972_s28 }
0x12f8   :  { %22 = sbr.rel (!%p20_p5) target bundleno = 2 (0x2), region = 105 }

</bundles_post_ra>
